<compile_context>
chip_gen: v6e
topology: v6e:2x2x1
jax: 0.10.0
libtpu: 0.0.40
codegen_flags: <defaults>
</compile_context>

<pallas_src>
import functools

import jax
import jax.numpy as jnp
from jax.experimental import pallas as pl
from jax.experimental.pallas import tpu as pltpu

LN_EPS = 1e-5
BN_EPS = 1e-5


def _layer_norm(x, gamma, beta):
    mu = jnp.mean(x, axis=-1, keepdims=True)
    var = jnp.mean((x - mu) ** 2, axis=-1, keepdims=True)
    return (x - mu) * jax.lax.rsqrt(var + LN_EPS) * gamma + beta


# ----------------------------------------------------------------------------
# Fused transformer blocks: grid = (batch_tiles, depth), depth innermost.
# ----------------------------------------------------------------------------
def transformer_blocks_kernel(x_ref, ln1g_ref, ln1b_ref, wqkv_ref, bqkv_ref,
                              wo_ref, bo_ref, ln2g_ref, ln2b_ref,
                              w1_ref, b1_ref, w2_ref, b2_ref,
                              o_ref, x_acc,
                              *, num_heads, batch_tile, n_tok):
    d_idx = pl.program_id(1)
    E = x_ref.shape[-1]
    dh = E // num_heads
    M = batch_tile * n_tok
    scale = 1.0 / (dh ** 0.5)

    # First layer of this batch tile: load the input into the resident scratch.
    @pl.when(d_idx == 0)
    def _():
        x_acc[...] = x_ref[...].reshape(M, E)

    x = x_acc[...]                                        # (M, E) f32

    # --- LayerNorm 1 + fused QKV projection (bf16 MXU, f32 accumulate) ---
    y = _layer_norm(x, ln1g_ref[0], ln1b_ref[0])
    qkv = jnp.dot(y.astype(jnp.bfloat16), wqkv_ref[0],
                  preferred_element_type=jnp.float32) + bqkv_ref[0]

    # --- Multi-head self-attention: all heads batched per batch element ---
    ctx_rows = []
    for b in range(batch_tile):                           # small static loop over batch
        r0, r1 = b * n_tok, (b + 1) * n_tok
        qb = pltpu.einshape("nhd->hnd",
                            qkv[r0:r1, 0 * E:1 * E].reshape(n_tok, num_heads, dh))
        kb = pltpu.einshape("nhd->hnd",
                            qkv[r0:r1, 1 * E:2 * E].reshape(n_tok, num_heads, dh))
        vb = pltpu.einshape("nhd->hnd",
                            qkv[r0:r1, 2 * E:3 * E].reshape(n_tok, num_heads, dh))

        s = jnp.einsum("hnd,hmd->hnm",
                       qb.astype(jnp.bfloat16), kb.astype(jnp.bfloat16),
                       preferred_element_type=jnp.float32) * scale
        s = s - jnp.max(s, axis=-1, keepdims=True)
        p = jnp.exp(s)
        p = p * pl.reciprocal(jnp.sum(p, axis=-1, keepdims=True), approx=True)
        cb = jnp.einsum("hnm,hmd->hnd",
                        p.astype(jnp.bfloat16), vb.astype(jnp.bfloat16),
                        preferred_element_type=jnp.float32)          # (H, N, dh)
        ctx_rows.append(pltpu.einshape("hnd->nhd", cb).reshape(n_tok, E))
    ctx = ctx_rows[0] if batch_tile == 1 else jnp.concatenate(ctx_rows, axis=0)

    attn = jnp.dot(ctx.astype(jnp.bfloat16), wo_ref[0],
                   preferred_element_type=jnp.float32) + bo_ref[0]
    x = x + attn                                          # residual 1 (dropout = identity)

    # --- LayerNorm 2 + MLP ---
    y2 = _layer_norm(x, ln2g_ref[0], ln2b_ref[0])
    h = jnp.dot(y2.astype(jnp.bfloat16), w1_ref[0],
                preferred_element_type=jnp.float32) + b1_ref[0]
    # TODO(synk): nn.GELU() defaults to the exact erf form; tanh approximation used here.
    h = jax.nn.gelu(h, approximate=True)
    m = jnp.dot(h.astype(jnp.bfloat16), w2_ref[0],
                preferred_element_type=jnp.float32) + b2_ref[0]
    x = x + m                                             # residual 2

    x_acc[...] = x                                        # carry to next layer

    @pl.when(d_idx == pl.num_programs(1) - 1)
    def _():
        o_ref[...] = x.reshape(batch_tile, n_tok, E).astype(o_ref.dtype)


def transformer_blocks(z, p, num_heads, batch_tile=None):
    B, N, E = z.shape
    depth = p["wqkv"].shape[0]
    Hb = p["w1"].shape[-1]
    if batch_tile is None or B % batch_tile != 0:
        batch_tile = B

    def wspec(shape):                                     # per-layer weight blocks
        return pl.BlockSpec(shape, lambda b, d: (d, 0, 0))

    kern = functools.partial(transformer_blocks_kernel, num_heads=num_heads,
                             batch_tile=batch_tile, n_tok=N)

    return pl.pallas_call(
        kern,
        out_shape=jax.ShapeDtypeStruct((B, N, E), z.dtype),
        grid=(B // batch_tile, depth),
        in_specs=[
            pl.BlockSpec((batch_tile, N, E), lambda b, d: (b, 0, 0)),
            wspec((1, 1, E)), wspec((1, 1, E)),
            wspec((1, E, 3 * E)), wspec((1, 1, 3 * E)),
            wspec((1, E, E)), wspec((1, 1, E)),
            wspec((1, 1, E)), wspec((1, 1, E)),
            wspec((1, E, Hb)), wspec((1, 1, Hb)),
            wspec((1, Hb, E)), wspec((1, 1, E)),
        ],
        out_specs=pl.BlockSpec((batch_tile, N, E), lambda b, d: (b, 0, 0)),
        scratch_shapes=[pltpu.VMEM((batch_tile * N, E), jnp.float32)],
        compiler_params=pltpu.CompilerParams(
            dimension_semantics=("parallel", "arbitrary")),
    )(z, p["ln1_g"], p["ln1_b"], p["wqkv"], p["bqkv"], p["wo"], p["bo"],
      p["ln2_g"], p["ln2_b"], p["w1"], p["b1"], p["w2"], p["b2"])


# ----------------------------------------------------------------------------
# Head MLP: Linear -> BN(eval) -> ReLU -> Linear -> BN(eval) -> ReLU -> Linear
# Tiled over the large H2 dimension; logits accumulated in the resident output.
# ----------------------------------------------------------------------------
def head_kernel(x_ref, w1_ref, b1_ref, g1_ref, be1_ref, m1_ref, v1_ref,
                w2_ref, b2_ref, g2_ref, be2_ref, m2_ref, v2_ref,
                w3_ref, b3_ref, o_ref, h1_acc):
    j = pl.program_id(0)

    @pl.when(j == 0)
    def _():
        h1 = jnp.dot(x_ref[...].astype(jnp.bfloat16), w1_ref[...],
                     preferred_element_type=jnp.float32) + b1_ref[...]
        h1 = (h1 - m1_ref[...]) * jax.lax.rsqrt(v1_ref[...] + BN_EPS) * g1_ref[...] + be1_ref[...]
        h1_acc[...] = jnp.maximum(h1, 0.0)
        o_ref[...] = jnp.broadcast_to(b3_ref[...], o_ref.shape)

    h2 = jnp.dot(h1_acc[...].astype(jnp.bfloat16), w2_ref[...],
                 preferred_element_type=jnp.float32) + b2_ref[...]
    h2 = (h2 - m2_ref[...]) * jax.lax.rsqrt(v2_ref[...] + BN_EPS) * g2_ref[...] + be2_ref[...]
    h2 = jnp.maximum(h2, 0.0)
    o_ref[...] += jnp.dot(h2.astype(jnp.bfloat16), w3_ref[...],
                          preferred_element_type=jnp.float32)


def classifier_head(cls_tok, p, h2_tile=256):
    B, E = cls_tok.shape
    H1 = p["w1"].shape[-1]
    H2 = p["w2"].shape[-1]
    C = p["w3"].shape[-1]
    if H2 % h2_tile != 0:
        h2_tile = H2

    def cspec(shape):                                     # grid-invariant blocks
        return pl.BlockSpec(shape, lambda j: (0, 0))

    def jspec(shape, which):                              # H2-tiled blocks
        if which == "col":
            return pl.BlockSpec(shape, lambda j: (0, j))
        return pl.BlockSpec(shape, lambda j: (j, 0))

    return pl.pallas_call(
        head_kernel,
        out_shape=jax.ShapeDtypeStruct((B, C), cls_tok.dtype),
        grid=(H2 // h2_tile,),
        in_specs=[
            cspec((B, E)),
            cspec((E, H1)), cspec((1, H1)), cspec((1, H1)),
            cspec((1, H1)), cspec((1, H1)), cspec((1, H1)),
            jspec((H1, h2_tile), "col"), jspec((1, h2_tile), "col"),
            jspec((1, h2_tile), "col"), jspec((1, h2_tile), "col"),
            jspec((1, h2_tile), "col"), jspec((1, h2_tile), "col"),
            jspec((h2_tile, C), "row"),
            cspec((1, C)),
        ],
        out_specs=pl.BlockSpec((B, C), lambda j: (0, 0)),
        scratch_shapes=[pltpu.VMEM((B, H1), jnp.float32)],
        compiler_params=pltpu.CompilerParams(dimension_semantics=("arbitrary",)),
    )(cls_tok, p["w1"], p["b1"], p["g1"], p["be1"], p["m1"], p["v1"],
      p["w2"], p["b2"], p["g2"], p["be2"], p["m2"], p["v2"], p["w3"], p["b3"])


# ----------------------------------------------------------------------------
# Full module forward
# ----------------------------------------------------------------------------
def tcait_classifier_forward(z_anchor, params, num_heads):
    z = transformer_blocks(z_anchor, params["blocks"], num_heads)
    cls_tok = z[:, 0]                                     # glue: CLS token select
    return classifier_head(cls_tok, params["head"])


# ----------------------------------------------------------------------------
# Deterministic parameter initialization (shapes follow the PyTorch __init__).
# Matmul weights stored in bf16; biases / LN / BN params stay f32.
# ----------------------------------------------------------------------------
def init_params(key, embed_dim, num_heads, num_classes, depth, mlp_ratio):
    E = embed_dim
    Hb = int(E * mlp_ratio)                 # transformer-block MLP hidden
    H1 = int(E * mlp_ratio)                 # head hidden 1
    H2 = int(E * mlp_ratio ** 2)            # head hidden 2

    def lin(k, fin, fout, lead=()):
        kw, kb = jax.random.split(k)
        w = jax.random.normal(kw, lead + (fin, fout), jnp.float32) * (1.0 / fin) ** 0.5
        b = jax.random.normal(kb, lead + (1, fout), jnp.float32) * 0.02
        return w, b

    kb1, kb2, kb3, kb4, kh1, kh2, kh3 = jax.random.split(key, 7)
    wqkv, bqkv = lin(kb1, E, 3 * E, (depth,))
    wo, bo = lin(kb2, E, E, (depth,))
    w1, b1 = lin(kb3, E, Hb, (depth,))
    w2, b2 = lin(kb4, Hb, E, (depth,))
    blocks = dict(
        ln1_g=jnp.ones((depth, 1, E), jnp.float32),
        ln1_b=jnp.zeros((depth, 1, E), jnp.float32),
        wqkv=wqkv.astype(jnp.bfloat16), bqkv=bqkv,
        wo=wo.astype(jnp.bfloat16), bo=bo,
        ln2_g=jnp.ones((depth, 1, E), jnp.float32),
        ln2_b=jnp.zeros((depth, 1, E), jnp.float32),
        w1=w1.astype(jnp.bfloat16), b1=b1,
        w2=w2.astype(jnp.bfloat16), b2=b2,
    )

    hw1, hb1 = lin(kh1, E, H1)
    hw2, hb2 = lin(kh2, H1, H2)
    hw3, hb3 = lin(kh3, H2, num_classes)
    head = dict(
        w1=hw1.astype(jnp.bfloat16), b1=hb1,
        g1=jnp.ones((1, H1), jnp.float32), be1=jnp.zeros((1, H1), jnp.float32),
        m1=jnp.zeros((1, H1), jnp.float32), v1=jnp.ones((1, H1), jnp.float32),
        w2=hw2.astype(jnp.bfloat16), b2=hb2,
        g2=jnp.ones((1, H2), jnp.float32), be2=jnp.zeros((1, H2), jnp.float32),
        m2=jnp.zeros((1, H2), jnp.float32), v2=jnp.ones((1, H2), jnp.float32),
        w3=hw3.astype(jnp.bfloat16), b3=hb3,
    )
    return dict(blocks=blocks, head=head)


if __name__ == "__main__":
    # Small shapes consistent with the module's forward.
    B, N, E = 2, 8, 32          # batch, tokens (token 0 = CLS), embed_dim
    NUM_HEADS = 4
    NUM_CLASSES = 10
    DEPTH = 2
    MLP_RATIO = 4.0

    root = jax.random.PRNGKey(0)
    k_in, k_param = jax.random.split(root)
    z_anchor = jax.random.normal(k_in, (B, N, E), jnp.float32)
    params = init_params(k_param, E, NUM_HEADS, NUM_CLASSES, DEPTH, MLP_RATIO)

    pred = tcait_classifier_forward(z_anchor, params, NUM_HEADS)
    pred = jax.block_until_ready(pred)
    assert pred.shape == (B, NUM_CLASSES), pred.shape
    # TODO(synk): BatchNorm1d is implemented in eval mode (running stats);
    # training-mode batch statistics and dropout are not modeled.
    print("KERNEL_OK")
</pallas_src>

<mosaic_0001>
module attributes {stable_mosaic.version = 11 : i64} {
  func.func @transformer_blocks_kernel(%arg0: i32, %arg1: i32, %arg2: memref<2x8x32xf32, #tpu.memory_space<vmem>>, %arg3: memref<1x1x32xf32, #tpu.memory_space<vmem>>, %arg4: memref<1x1x32xf32, #tpu.memory_space<vmem>>, %arg5: memref<1x32x96xbf16, #tpu.memory_space<vmem>>, %arg6: memref<1x1x96xf32, #tpu.memory_space<vmem>>, %arg7: memref<1x32x32xbf16, #tpu.memory_space<vmem>>, %arg8: memref<1x1x32xf32, #tpu.memory_space<vmem>>, %arg9: memref<1x1x32xf32, #tpu.memory_space<vmem>>, %arg10: memref<1x1x32xf32, #tpu.memory_space<vmem>>, %arg11: memref<1x32x128xbf16, #tpu.memory_space<vmem>>, %arg12: memref<1x1x128xf32, #tpu.memory_space<vmem>>, %arg13: memref<1x128x32xbf16, #tpu.memory_space<vmem>>, %arg14: memref<1x1x32xf32, #tpu.memory_space<vmem>>, %arg15: memref<2x8x32xf32, #tpu.memory_space<vmem>>, %arg16: memref<16x32xf32, #tpu.memory_space<vmem>>) attributes {dimension_semantics = [#tpu.dimension_semantics<parallel>, #tpu.dimension_semantics<arbitrary>], iteration_bounds = array<i64: 1, 2>, scalar_prefetch = 0 : i64, scratch_operands = 1 : i64, tpu.core_type = #tpu.core_type<tc>, window_params = [{transform_indices = @transform_0, window_bounds = array<i64: 2, 8, 32>}, {transform_indices = @transform_1, window_bounds = array<i64: 1, 1, 32>}, {transform_indices = @transform_2, window_bounds = array<i64: 1, 1, 32>}, {transform_indices = @transform_3, window_bounds = array<i64: 1, 32, 96>}, {transform_indices = @transform_4, window_bounds = array<i64: 1, 1, 96>}, {transform_indices = @transform_5, window_bounds = array<i64: 1, 32, 32>}, {transform_indices = @transform_6, window_bounds = array<i64: 1, 1, 32>}, {transform_indices = @transform_7, window_bounds = array<i64: 1, 1, 32>}, {transform_indices = @transform_8, window_bounds = array<i64: 1, 1, 32>}, {transform_indices = @transform_9, window_bounds = array<i64: 1, 32, 128>}, {transform_indices = @transform_10, window_bounds = array<i64: 1, 1, 128>}, {transform_indices = @transform_11, window_bounds = array<i64: 1, 128, 32>}, {transform_indices = @transform_12, window_bounds = array<i64: 1, 1, 32>}, {transform_indices = @transform_13, window_bounds = array<i64: 2, 8, 32>}]} {
    %c0_i32 = arith.constant 0 : i32
    %0 = arith.cmpi eq, %arg1, %c0_i32 : i32
    %1 = arith.extui %0 : i1 to i32
    %c0_i32_0 = arith.constant 0 : i32
    %2 = arith.cmpi ne, %1, %c0_i32_0 : i32
    scf.if %2 {
      %c0_68 = arith.constant 0 : index
      %c0_69 = arith.constant 0 : index
      %c0_70 = arith.constant 0 : index
      %166 = vector.load %arg2[%c0_68, %c0_69, %c0_70] : memref<2x8x32xf32, #tpu.memory_space<vmem>>, vector<2x8x32xf32>
      %167 = vector.shape_cast %166 : vector<2x8x32xf32> to vector<16x32xf32>
      %c0_71 = arith.constant 0 : index
      %c0_72 = arith.constant 0 : index
      %168 = vector.load %arg16[%c0_71, %c0_72] : memref<16x32xf32, #tpu.memory_space<vmem>>, vector<16x32xf32>
      tpu.vector_store %arg16[%c0_71, %c0_72], %167 {strides = array<i32>} : memref<16x32xf32, #tpu.memory_space<vmem>>, vector<16x32xf32>,
    } else {
    }
    %c0 = arith.constant 0 : index
    %c0_1 = arith.constant 0 : index
    %3 = vector.load %arg16[%c0, %c0_1] : memref<16x32xf32, #tpu.memory_space<vmem>>, vector<16x32xf32>
    %c0_2 = arith.constant 0 : index
    %c0_3 = arith.constant 0 : index
    %c0_4 = arith.constant 0 : index
    %4 = vector.load %arg3[%c0_2, %c0_3, %c0_4] : memref<1x1x32xf32, #tpu.memory_space<vmem>>, vector<1x1x32xf32>
    %5 = vector.shape_cast %4 : vector<1x1x32xf32> to vector<1x32xf32>
    %c0_5 = arith.constant 0 : index
    %c0_6 = arith.constant 0 : index
    %c0_7 = arith.constant 0 : index
    %6 = vector.load %arg4[%c0_5, %c0_6, %c0_7] : memref<1x1x32xf32, #tpu.memory_space<vmem>>, vector<1x1x32xf32>
    %7 = vector.shape_cast %6 : vector<1x1x32xf32> to vector<1x32xf32>
    %cst = arith.constant dense<0.000000e+00> : vector<16xf32>
    %8 = vector.multi_reduction <add>, %3, %cst [1] : vector<16x32xf32> to vector<16xf32>
    %9 = vector.shape_cast %8 : vector<16xf32> to vector<16x1xf32>
    %cst_8 = arith.constant 3.200000e+01 : f32
    %10 = vector.broadcast %cst_8 : f32 to vector<16x1xf32>
    %11 = arith.divf %9, %10 : vector<16x1xf32>
    %12 = vector.broadcast %11 : vector<16x1xf32> to vector<16x32xf32>
    %13 = arith.subf %3, %12 : vector<16x32xf32>
    %14 = arith.mulf %13, %13 : vector<16x32xf32>
    %cst_9 = arith.constant dense<0.000000e+00> : vector<16xf32>
    %15 = vector.multi_reduction <add>, %14, %cst_9 [1] : vector<16x32xf32> to vector<16xf32>
    %16 = vector.shape_cast %15 : vector<16xf32> to vector<16x1xf32>
    %cst_10 = arith.constant 3.200000e+01 : f32
    %17 = vector.broadcast %cst_10 : f32 to vector<16x1xf32>
    %18 = arith.divf %16, %17 : vector<16x1xf32>
    %19 = vector.broadcast %11 : vector<16x1xf32> to vector<16x32xf32>
    %20 = arith.subf %3, %19 : vector<16x32xf32>
    %cst_11 = arith.constant 9.99999974E-6 : f32
    %21 = vector.broadcast %cst_11 : f32 to vector<16x1xf32>
    %22 = arith.addf %18, %21 : vector<16x1xf32>
    %23 = math.rsqrt %22 : vector<16x1xf32>
    %24 = vector.broadcast %23 : vector<16x1xf32> to vector<16x32xf32>
    %25 = arith.mulf %20, %24 : vector<16x32xf32>
    %26 = vector.broadcast %5 : vector<1x32xf32> to vector<16x32xf32>
    %27 = arith.mulf %25, %26 : vector<16x32xf32>
    %28 = vector.broadcast %7 : vector<1x32xf32> to vector<16x32xf32>
    %29 = arith.addf %27, %28 : vector<16x32xf32>
    %30 = arith.truncf %29 : vector<16x32xf32> to vector<16x32xbf16>
    %c0_12 = arith.constant 0 : index
    %c0_13 = arith.constant 0 : index
    %c0_14 = arith.constant 0 : index
    %31 = vector.load %arg5[%c0_12, %c0_13, %c0_14] : memref<1x32x96xbf16, #tpu.memory_space<vmem>>, vector<1x32x96xbf16>
    %32 = vector.shape_cast %31 : vector<1x32x96xbf16> to vector<32x96xbf16>
    %cst_15 = arith.constant dense<0.000000e+00> : vector<16x96xf32>
    %33 = tpu.matmul %30, %32, %cst_15 {dimension_numbers = #tpu.dot_dimension_numbers<[1], [0], [0], [1], [0, 0, 1, 1], [], []>} : vector<16x32xbf16>, vector<32x96xbf16>, vector<16x96xf32> -> vector<16x96xf32>
    %c0_16 = arith.constant 0 : index
    %c0_17 = arith.constant 0 : index
    %c0_18 = arith.constant 0 : index
    %34 = vector.load %arg6[%c0_16, %c0_17, %c0_18] : memref<1x1x96xf32, #tpu.memory_space<vmem>>, vector<1x1x96xf32>
    %35 = vector.shape_cast %34 : vector<1x1x96xf32> to vector<1x96xf32>
    %36 = vector.broadcast %35 : vector<1x96xf32> to vector<16x96xf32>
    %37 = arith.addf %33, %36 : vector<16x96xf32>
    %38 = vector.extract_strided_slice %37 {offsets = [0, 0], sizes = [8, 32], strides = [1, 1]} : vector<16x96xf32> to vector<8x32xf32>
    %39 = vector.shape_cast %38 : vector<8x32xf32> to vector<8x4x8xf32>
    %40 = tpu.transpose %39, [1, 0, 2] : vector<8x4x8xf32> -> vector<4x8x8xf32>
    %41 = vector.extract_strided_slice %37 {offsets = [0, 32], sizes = [8, 32], strides = [1, 1]} : vector<16x96xf32> to vector<8x32xf32>
    %42 = vector.shape_cast %41 : vector<8x32xf32> to vector<8x4x8xf32>
    %43 = tpu.transpose %42, [1, 0, 2] : vector<8x4x8xf32> -> vector<4x8x8xf32>
    %44 = vector.extract_strided_slice %37 {offsets = [0, 64], sizes = [8, 32], strides = [1, 1]} : vector<16x96xf32> to vector<8x32xf32>
    %45 = vector.shape_cast %44 : vector<8x32xf32> to vector<8x4x8xf32>
    %46 = tpu.transpose %45, [1, 0, 2] : vector<8x4x8xf32> -> vector<4x8x8xf32>
    %47 = arith.truncf %40 : vector<4x8x8xf32> to vector<4x8x8xbf16>
    %48 = arith.truncf %43 : vector<4x8x8xf32> to vector<4x8x8xbf16>
    "tpu.trace_start"() <{level = 10 : i32, message = "hnd,hmd->hnm"}> : () -> ()
    %cst_19 = arith.constant dense<0.000000e+00> : vector<4x8x8xf32>
    %49 = tpu.matmul %47, %48, %cst_19 {dimension_numbers = #tpu.dot_dimension_numbers<[2], [2], [1], [1], [0, 0, 0, 1, 1, 1], [0], [0]>} : vector<4x8x8xbf16>, vector<4x8x8xbf16>, vector<4x8x8xf32> -> vector<4x8x8xf32>
    "tpu.trace_stop"() : () -> ()
    %cst_20 = arith.constant 0.353553385 : f32
    %50 = vector.broadcast %cst_20 : f32 to vector<4x8x8xf32>
    %51 = arith.mulf %49, %50 : vector<4x8x8xf32>
    %cst_21 = arith.constant dense<0xFF800000> : vector<4x8xf32>
    %52 = vector.multi_reduction <maximumf>, %51, %cst_21 [2] : vector<4x8x8xf32> to vector<4x8xf32>
    %53 = vector.shape_cast %52 : vector<4x8xf32> to vector<4x8x1xf32>
    %54 = vector.broadcast %53 : vector<4x8x1xf32> to vector<4x8x8xf32>
    %55 = arith.subf %51, %54 : vector<4x8x8xf32>
    %56 = math.exp %55 : vector<4x8x8xf32>
    %cst_22 = arith.constant dense<0.000000e+00> : vector<4x8xf32>
    %57 = vector.multi_reduction <add>, %56, %cst_22 [2] : vector<4x8x8xf32> to vector<4x8xf32>
    %58 = vector.shape_cast %57 : vector<4x8xf32> to vector<4x8x1xf32>
    %59 = tpu.reciprocal %58 {approx = true} : vector<4x8x1xf32> -> vector<4x8x1xf32>
    %60 = vector.broadcast %59 : vector<4x8x1xf32> to vector<4x8x8xf32>
    %61 = arith.mulf %56, %60 : vector<4x8x8xf32>
    %62 = arith.truncf %61 : vector<4x8x8xf32> to vector<4x8x8xbf16>
    %63 = arith.truncf %46 : vector<4x8x8xf32> to vector<4x8x8xbf16>
    "tpu.trace_start"() <{level = 10 : i32, message = "hnm,hmd->hnd"}> : () -> ()
    %cst_23 = arith.constant dense<0.000000e+00> : vector<4x8x8xf32>
    %64 = tpu.matmul %62, %63, %cst_23 {dimension_numbers = #tpu.dot_dimension_numbers<[2], [1], [1], [2], [0, 0, 0, 1, 1, 2], [0], [0]>} : vector<4x8x8xbf16>, vector<4x8x8xbf16>, vector<4x8x8xf32> -> vector<4x8x8xf32>
    "tpu.trace_stop"() : () -> ()
    %65 = tpu.transpose %64, [1, 0, 2] : vector<4x8x8xf32> -> vector<8x4x8xf32>
    %66 = vector.shape_cast %65 : vector<8x4x8xf32> to vector<8x32xf32>
    %67 = vector.extract_strided_slice %37 {offsets = [8, 0], sizes = [8, 32], strides = [1, 1]} : vector<16x96xf32> to vector<8x32xf32>
    %68 = vector.shape_cast %67 : vector<8x32xf32> to vector<8x4x8xf32>
    %69 = tpu.transpose %68, [1, 0, 2] : vector<8x4x8xf32> -> vector<4x8x8xf32>
    %70 = vector.extract_strided_slice %37 {offsets = [8, 32], sizes = [8, 32], strides = [1, 1]} : vector<16x96xf32> to vector<8x32xf32>
    %71 = vector.shape_cast %70 : vector<8x32xf32> to vector<8x4x8xf32>
    %72 = tpu.transpose %71, [1, 0, 2] : vector<8x4x8xf32> -> vector<4x8x8xf32>
    %73 = vector.extract_strided_slice %37 {offsets = [8, 64], sizes = [8, 32], strides = [1, 1]} : vector<16x96xf32> to vector<8x32xf32>
    %74 = vector.shape_cast %73 : vector<8x32xf32> to vector<8x4x8xf32>
    %75 = tpu.transpose %74, [1, 0, 2] : vector<8x4x8xf32> -> vector<4x8x8xf32>
    %76 = arith.truncf %69 : vector<4x8x8xf32> to vector<4x8x8xbf16>
    %77 = arith.truncf %72 : vector<4x8x8xf32> to vector<4x8x8xbf16>
    "tpu.trace_start"() <{level = 10 : i32, message = "hnd,hmd->hnm"}> : () -> ()
    %cst_24 = arith.constant dense<0.000000e+00> : vector<4x8x8xf32>
    %78 = tpu.matmul %76, %77, %cst_24 {dimension_numbers = #tpu.dot_dimension_numbers<[2], [2], [1], [1], [0, 0, 0, 1, 1, 1], [0], [0]>} : vector<4x8x8xbf16>, vector<4x8x8xbf16>, vector<4x8x8xf32> -> vector<4x8x8xf32>
    "tpu.trace_stop"() : () -> ()
    %cst_25 = arith.constant 0.353553385 : f32
    %79 = vector.broadcast %cst_25 : f32 to vector<4x8x8xf32>
    %80 = arith.mulf %78, %79 : vector<4x8x8xf32>
    %cst_26 = arith.constant dense<0xFF800000> : vector<4x8xf32>
    %81 = vector.multi_reduction <maximumf>, %80, %cst_26 [2] : vector<4x8x8xf32> to vector<4x8xf32>
    %82 = vector.shape_cast %81 : vector<4x8xf32> to vector<4x8x1xf32>
    %83 = vector.broadcast %82 : vector<4x8x1xf32> to vector<4x8x8xf32>
    %84 = arith.subf %80, %83 : vector<4x8x8xf32>
    %85 = math.exp %84 : vector<4x8x8xf32>
    %cst_27 = arith.constant dense<0.000000e+00> : vector<4x8xf32>
    %86 = vector.multi_reduction <add>, %85, %cst_27 [2] : vector<4x8x8xf32> to vector<4x8xf32>
    %87 = vector.shape_cast %86 : vector<4x8xf32> to vector<4x8x1xf32>
    %88 = tpu.reciprocal %87 {approx = true} : vector<4x8x1xf32> -> vector<4x8x1xf32>
    %89 = vector.broadcast %88 : vector<4x8x1xf32> to vector<4x8x8xf32>
    %90 = arith.mulf %85, %89 : vector<4x8x8xf32>
    %91 = arith.truncf %90 : vector<4x8x8xf32> to vector<4x8x8xbf16>
    %92 = arith.truncf %75 : vector<4x8x8xf32> to vector<4x8x8xbf16>
    "tpu.trace_start"() <{level = 10 : i32, message = "hnm,hmd->hnd"}> : () -> ()
    %cst_28 = arith.constant dense<0.000000e+00> : vector<4x8x8xf32>
    %93 = tpu.matmul %91, %92, %cst_28 {dimension_numbers = #tpu.dot_dimension_numbers<[2], [1], [1], [2], [0, 0, 0, 1, 1, 2], [0], [0]>} : vector<4x8x8xbf16>, vector<4x8x8xbf16>, vector<4x8x8xf32> -> vector<4x8x8xf32>
    "tpu.trace_stop"() : () -> ()
    %94 = tpu.transpose %93, [1, 0, 2] : vector<4x8x8xf32> -> vector<8x4x8xf32>
    %95 = vector.shape_cast %94 : vector<8x4x8xf32> to vector<8x32xf32>
    %96 = tpu.concatenate %66, %95 in 0 : vector<8x32xf32>, vector<8x32xf32> -> vector<16x32xf32>
    %97 = arith.truncf %96 : vector<16x32xf32> to vector<16x32xbf16>
    %c0_29 = arith.constant 0 : index
    %c0_30 = arith.constant 0 : index
    %c0_31 = arith.constant 0 : index
    %98 = vector.load %arg7[%c0_29, %c0_30, %c0_31] : memref<1x32x32xbf16, #tpu.memory_space<vmem>>, vector<1x32x32xbf16>
    %99 = vector.shape_cast %98 : vector<1x32x32xbf16> to vector<32x32xbf16>
    %cst_32 = arith.constant dense<0.000000e+00> : vector<16x32xf32>
    %100 = tpu.matmul %97, %99, %cst_32 {dimension_numbers = #tpu.dot_dimension_numbers<[1], [0], [0], [1], [0, 0, 1, 1], [], []>} : vector<16x32xbf16>, vector<32x32xbf16>, vector<16x32xf32> -> vector<16x32xf32>
    %c0_33 = arith.constant 0 : index
    %c0_34 = arith.constant 0 : index
    %c0_35 = arith.constant 0 : index
    %101 = vector.load %arg8[%c0_33, %c0_34, %c0_35] : memref<1x1x32xf32, #tpu.memory_space<vmem>>, vector<1x1x32xf32>
    %102 = vector.shape_cast %101 : vector<1x1x32xf32> to vector<1x32xf32>
    %103 = vector.broadcast %102 : vector<1x32xf32> to vector<16x32xf32>
    %104 = arith.addf %100, %103 : vector<16x32xf32>
    %105 = arith.addf %3, %104 : vector<16x32xf32>
    %c0_36 = arith.constant 0 : index
    %c0_37 = arith.constant 0 : index
    %c0_38 = arith.constant 0 : index
    %106 = vector.load %arg9[%c0_36, %c0_37, %c0_38] : memref<1x1x32xf32, #tpu.memory_space<vmem>>, vector<1x1x32xf32>
    %107 = vector.shape_cast %106 : vector<1x1x32xf32> to vector<1x32xf32>
    %c0_39 = arith.constant 0 : index
    %c0_40 = arith.constant 0 : index
    %c0_41 = arith.constant 0 : index
    %108 = vector.load %arg10[%c0_39, %c0_40, %c0_41] : memref<1x1x32xf32, #tpu.memory_space<vmem>>, vector<1x1x32xf32>
    %109 = vector.shape_cast %108 : vector<1x1x32xf32> to vector<1x32xf32>
    %cst_42 = arith.constant dense<0.000000e+00> : vector<16xf32>
    %110 = vector.multi_reduction <add>, %105, %cst_42 [1] : vector<16x32xf32> to vector<16xf32>
    %111 = vector.shape_cast %110 : vector<16xf32> to vector<16x1xf32>
    %cst_43 = arith.constant 3.200000e+01 : f32
    %112 = vector.broadcast %cst_43 : f32 to vector<16x1xf32>
    %113 = arith.divf %111, %112 : vector<16x1xf32>
    %114 = vector.broadcast %113 : vector<16x1xf32> to vector<16x32xf32>
    %115 = arith.subf %105, %114 : vector<16x32xf32>
    %116 = arith.mulf %115, %115 : vector<16x32xf32>
    %cst_44 = arith.constant dense<0.000000e+00> : vector<16xf32>
    %117 = vector.multi_reduction <add>, %116, %cst_44 [1] : vector<16x32xf32> to vector<16xf32>
    %118 = vector.shape_cast %117 : vector<16xf32> to vector<16x1xf32>
    %cst_45 = arith.constant 3.200000e+01 : f32
    %119 = vector.broadcast %cst_45 : f32 to vector<16x1xf32>
    %120 = arith.divf %118, %119 : vector<16x1xf32>
    %121 = vector.broadcast %113 : vector<16x1xf32> to vector<16x32xf32>
    %122 = arith.subf %105, %121 : vector<16x32xf32>
    %cst_46 = arith.constant 9.99999974E-6 : f32
    %123 = vector.broadcast %cst_46 : f32 to vector<16x1xf32>
    %124 = arith.addf %120, %123 : vector<16x1xf32>
    %125 = math.rsqrt %124 : vector<16x1xf32>
    %126 = vector.broadcast %125 : vector<16x1xf32> to vector<16x32xf32>
    %127 = arith.mulf %122, %126 : vector<16x32xf32>
    %128 = vector.broadcast %107 : vector<1x32xf32> to vector<16x32xf32>
    %129 = arith.mulf %127, %128 : vector<16x32xf32>
    %130 = vector.broadcast %109 : vector<1x32xf32> to vector<16x32xf32>
    %131 = arith.addf %129, %130 : vector<16x32xf32>
    %132 = arith.truncf %131 : vector<16x32xf32> to vector<16x32xbf16>
    %c0_47 = arith.constant 0 : index
    %c0_48 = arith.constant 0 : index
    %c0_49 = arith.constant 0 : index
    %133 = vector.load %arg11[%c0_47, %c0_48, %c0_49] : memref<1x32x128xbf16, #tpu.memory_space<vmem>>, vector<1x32x128xbf16>
    %134 = vector.shape_cast %133 : vector<1x32x128xbf16> to vector<32x128xbf16>
    %cst_50 = arith.constant dense<0.000000e+00> : vector<16x128xf32>
    %135 = tpu.matmul %132, %134, %cst_50 {dimension_numbers = #tpu.dot_dimension_numbers<[1], [0], [0], [1], [0, 0, 1, 1], [], []>} : vector<16x32xbf16>, vector<32x128xbf16>, vector<16x128xf32> -> vector<16x128xf32>
    %c0_51 = arith.constant 0 : index
    %c0_52 = arith.constant 0 : index
    %c0_53 = arith.constant 0 : index
    %136 = vector.load %arg12[%c0_51, %c0_52, %c0_53] : memref<1x1x128xf32, #tpu.memory_space<vmem>>, vector<1x1x128xf32>
    %137 = vector.shape_cast %136 : vector<1x1x128xf32> to vector<1x128xf32>
    %138 = vector.broadcast %137 : vector<1x128xf32> to vector<16x128xf32>
    %139 = arith.addf %135, %138 : vector<16x128xf32>
    %140 = arith.mulf %139, %139 : vector<16x128xf32>
    %141 = arith.mulf %139, %140 : vector<16x128xf32>
    %cst_54 = arith.constant 4.471500e-02 : f32
    %142 = vector.broadcast %cst_54 : f32 to vector<16x128xf32>
    %143 = arith.mulf %142, %141 : vector<16x128xf32>
    %144 = arith.addf %139, %143 : vector<16x128xf32>
    %cst_55 = arith.constant 0.797884583 : f32
    %145 = vector.broadcast %cst_55 : f32 to vector<16x128xf32>
    %146 = arith.mulf %145, %144 : vector<16x128xf32>
    %147 = math.tanh %146 : vector<16x128xf32>
    %cst_56 = arith.constant 1.000000e+00 : f32
    %148 = vector.broadcast %cst_56 : f32 to vector<16x128xf32>
    %149 = arith.addf %148, %147 : vector<16x128xf32>
    %cst_57 = arith.constant 5.000000e-01 : f32
    %150 = vector.broadcast %cst_57 : f32 to vector<16x128xf32>
    %151 = arith.mulf %150, %149 : vector<16x128xf32>
    %152 = arith.mulf %139, %151 : vector<16x128xf32>
    %153 = arith.truncf %152 : vector<16x128xf32> to vector<16x128xbf16>
    %c0_58 = arith.constant 0 : index
    %c0_59 = arith.constant 0 : index
    %c0_60 = arith.constant 0 : index
    %154 = vector.load %arg13[%c0_58, %c0_59, %c0_60] : memref<1x128x32xbf16, #tpu.memory_space<vmem>>, vector<1x128x32xbf16>
    %155 = vector.shape_cast %154 : vector<1x128x32xbf16> to vector<128x32xbf16>
    %cst_61 = arith.constant dense<0.000000e+00> : vector<16x32xf32>
    %156 = tpu.matmul %153, %155, %cst_61 {dimension_numbers = #tpu.dot_dimension_numbers<[1], [0], [0], [1], [0, 0, 1, 1], [], []>} : vector<16x128xbf16>, vector<128x32xbf16>, vector<16x32xf32> -> vector<16x32xf32>
    %c0_62 = arith.constant 0 : index
    %c0_63 = arith.constant 0 : index
    %c0_64 = arith.constant 0 : index
    %157 = vector.load %arg14[%c0_62, %c0_63, %c0_64] : memref<1x1x32xf32, #tpu.memory_space<vmem>>, vector<1x1x32xf32>
    %158 = vector.shape_cast %157 : vector<1x1x32xf32> to vector<1x32xf32>
    %159 = vector.broadcast %158 : vector<1x32xf32> to vector<16x32xf32>
    %160 = arith.addf %156, %159 : vector<16x32xf32>
    %161 = arith.addf %105, %160 : vector<16x32xf32>
    %c0_65 = arith.constant 0 : index
    %c0_66 = arith.constant 0 : index
    %162 = vector.load %arg16[%c0_65, %c0_66] : memref<16x32xf32, #tpu.memory_space<vmem>>, vector<16x32xf32>
    tpu.vector_store %arg16[%c0_65, %c0_66], %161 {strides = array<i32>} : memref<16x32xf32, #tpu.memory_space<vmem>>, vector<16x32xf32>,
    %c1_i32 = arith.constant 1 : i32
    %163 = arith.cmpi eq, %arg1, %c1_i32 : i32
    %164 = arith.extui %163 : i1 to i32
    %c0_i32_67 = arith.constant 0 : i32
    %165 = arith.cmpi ne, %164, %c0_i32_67 : i32
    scf.if %165 {
      %166 = vector.shape_cast %161 : vector<16x32xf32> to vector<2x8x32xf32>
      %c0_68 = arith.constant 0 : index
      %c0_69 = arith.constant 0 : index
      %c0_70 = arith.constant 0 : index
      %167 = vector.load %arg15[%c0_68, %c0_69, %c0_70] : memref<2x8x32xf32, #tpu.memory_space<vmem>>, vector<2x8x32xf32>
      tpu.vector_store %arg15[%c0_68, %c0_69, %c0_70], %166 {strides = array<i32>} : memref<2x8x32xf32, #tpu.memory_space<vmem>>, vector<2x8x32xf32>,
    } else {
    }
    return
  }
  func.func @transform_0(%arg0: i32, %arg1: i32) -> (i32, i32, i32) {
    %c0_i32 = arith.constant 0 : i32
    %c0_i32_0 = arith.constant 0 : i32
    %c0_i32_1 = arith.constant 0 : i32
    return %arg0, %c0_i32, %c0_i32_0 : i32, i32, i32
  }
  func.func @transform_1(%arg0: i32, %arg1: i32) -> (i32, i32, i32) {
    %c0_i32 = arith.constant 0 : i32
    %c0_i32_0 = arith.constant 0 : i32
    %c0_i32_1 = arith.constant 0 : i32
    return %arg1, %c0_i32, %c0_i32_0 : i32, i32, i32
  }
  func.func @transform_2(%arg0: i32, %arg1: i32) -> (i32, i32, i32) {
    %c0_i32 = arith.constant 0 : i32
    %c0_i32_0 = arith.constant 0 : i32
    %c0_i32_1 = arith.constant 0 : i32
    return %arg1, %c0_i32, %c0_i32_0 : i32, i32, i32
  }
  func.func @transform_3(%arg0: i32, %arg1: i32) -> (i32, i32, i32) {
    %c0_i32 = arith.constant 0 : i32
    %c0_i32_0 = arith.constant 0 : i32
    %c0_i32_1 = arith.constant 0 : i32
    return %arg1, %c0_i32, %c0_i32_0 : i32, i32, i32
  }
  func.func @transform_4(%arg0: i32, %arg1: i32) -> (i32, i32, i32) {
    %c0_i32 = arith.constant 0 : i32
    %c0_i32_0 = arith.constant 0 : i32
    %c0_i32_1 = arith.constant 0 : i32
    return %arg1, %c0_i32, %c0_i32_0 : i32, i32, i32
  }
  func.func @transform_5(%arg0: i32, %arg1: i32) -> (i32, i32, i32) {
    %c0_i32 = arith.constant 0 : i32
    %c0_i32_0 = arith.constant 0 : i32
    %c0_i32_1 = arith.constant 0 : i32
    return %arg1, %c0_i32, %c0_i32_0 : i32, i32, i32
  }
  func.func @transform_6(%arg0: i32, %arg1: i32) -> (i32, i32, i32) {
    %c0_i32 = arith.constant 0 : i32
    %c0_i32_0 = arith.constant 0 : i32
    %c0_i32_1 = arith.constant 0 : i32
    return %arg1, %c0_i32, %c0_i32_0 : i32, i32, i32
  }
  func.func @transform_7(%arg0: i32, %arg1: i32) -> (i32, i32, i32) {
    %c0_i32 = arith.constant 0 : i32
    %c0_i32_0 = arith.constant 0 : i32
    %c0_i32_1 = arith.constant 0 : i32
    return %arg1, %c0_i32, %c0_i32_0 : i32, i32, i32
  }
  func.func @transform_8(%arg0: i32, %arg1: i32) -> (i32, i32, i32) {
    %c0_i32 = arith.constant 0 : i32
    %c0_i32_0 = arith.constant 0 : i32
    %c0_i32_1 = arith.constant 0 : i32
    return %arg1, %c0_i32, %c0_i32_0 : i32, i32, i32
  }
  func.func @transform_9(%arg0: i32, %arg1: i32) -> (i32, i32, i32) {
    %c0_i32 = arith.constant 0 : i32
    %c0_i32_0 = arith.constant 0 : i32
    %c0_i32_1 = arith.constant 0 : i32
    return %arg1, %c0_i32, %c0_i32_0 : i32, i32, i32
  }
  func.func @transform_10(%arg0: i32, %arg1: i32) -> (i32, i32, i32) {
    %c0_i32 = arith.constant 0 : i32
    %c0_i32_0 = arith.constant 0 : i32
    %c0_i32_1 = arith.constant 0 : i32
    return %arg1, %c0_i32, %c0_i32_0 : i32, i32, i32
  }
  func.func @transform_11(%arg0: i32, %arg1: i32) -> (i32, i32, i32) {
    %c0_i32 = arith.constant 0 : i32
    %c0_i32_0 = arith.constant 0 : i32
    %c0_i32_1 = arith.constant 0 : i32
    return %arg1, %c0_i32, %c0_i32_0 : i32, i32, i32
  }
  func.func @transform_12(%arg0: i32, %arg1: i32) -> (i32, i32, i32) {
    %c0_i32 = arith.constant 0 : i32
    %c0_i32_0 = arith.constant 0 : i32
    %c0_i32_1 = arith.constant 0 : i32
    return %arg1, %c0_i32, %c0_i32_0 : i32, i32, i32
  }
  func.func @transform_13(%arg0: i32, %arg1: i32) -> (i32, i32, i32) {
    %c0_i32 = arith.constant 0 : i32
    %c0_i32_0 = arith.constant 0 : i32
    %c0_i32_1 = arith.constant 0 : i32
    return %arg0, %c0_i32, %c0_i32_0 : i32, i32, i32
  }
}

</mosaic_0001>

<bundles_post_ra>
// kernel: tpu_custom_call.1
= control target key start
LH: loop header
LB: loop body
LE: loop exit
PB: predicated region body
PF: predicated region fallthrough
CT: control target
= control target key end

     0   :  { %s4450_s0 = inlined_call_operand.vmem [shape: f32[2,8,32], index: 0, kind: input, shape index: {}]   ;;  %s4451_s1 = inlined_call_operand.vmem [shape: f32[2,1,32], index: 1, kind: input, shape index: {}]   ;;  %s4452_s2 = inlined_call_operand.vmem [shape: f32[2,1,32], index: 2, kind: input, shape index: {}]   ;;  %s4453_s3 = inlined_call_operand.vmem [shape: bf16[2,32,96], index: 3, kind: input, shape index: {}]   ;;  %s4454_s4 = inlined_call_operand.vmem [shape: f32[2,1,96], index: 4, kind: input, shape index: {}]   ;;  %s4455_s5 = inlined_call_operand.vmem [shape: bf16[2,32,32], index: 5, kind: input, shape index: {}]   ;;  %s4456_s6 = inlined_call_operand.vmem [shape: f32[2,1,32], index: 6, kind: input, shape index: {}]   ;;  %s4457_s7 = inlined_call_operand.vmem [shape: f32[2,1,32], index: 7, kind: input, shape index: {}]   ;;  %s4458_s8 = inlined_call_operand.vmem [shape: f32[2,1,32], index: 8, kind: input, shape index: {}]   ;;  %s4459_s9 = inlined_call_operand.vmem [shape: bf16[2,32,128], index: 9, kind: input, shape index: {}]   ;;  %s4460_s10 = inlined_call_operand.vmem [shape: f32[2,1,128], index: 10, kind: input, shape index: {}]   ;;  %s4461_s11 = inlined_call_operand.vmem [shape: bf16[2,128,32], index: 11, kind: input, shape index: {}]   ;;  %s4462_s12 = inlined_call_operand.vmem [shape: f32[2,1,32], index: 12, kind: input, shape index: {}]   ;;  %s4463_s13 = inlined_call_operand.hbm [shape: f32[2,8,32], index: 13, kind: output, shape index: {}]  }
   0x1   :  { %4467 = sst [smem:[#allocation10_spill]] %s4453_s3 }
   0x2   :  { %4468 = sst [smem:[#allocation11_spill]] %s4455_s5 }
   0x3   :  { %4469 = sst [smem:[#allocation12_spill]] %s4463_s13 }
   0x4   :  { %18 = vsyncpa [#allocation4], 0  ;;  %s3852_s25 = smov 0   ;;  %s3854_s26 = smov 0  }
   0x5   :  { %s3856_s27 = smov 0  }
   0x6 LB: > { %4470 = sst [smem:[#allocation6_spill]] %s3762_s26  ;;  %s33_s29 = sadd.s32 1, %s3762_s26  ;;  %s3766_s27 = sphi %s3856_s27, %s24_s27   ;;  %s3762_s26 = sphi %s3854_s26, %s4487_s26   ;;  %s3758_s25 = sphi %s3852_s25, %s4486_s25  }
   0x7   : > { %4471 = sst [smem:[#allocation7_spill]] %s3766_s27  ;;  %p34_p0 = scmp.ge.s32.totalorder %s33_s29, 2 }
   0x8   : > { %p3331_p1 = scmp.ge.s32.totalorder %s3766_s27, 1  ;;  %p505_p2 = scmp.lt.s32.totalorder %s3766_s27, 3 }
   0x9   : > { %s4489_s29 = smov (%p34_p0, %s33_s29), 0 }
   0xa   : > { %4472 = sst [smem:[#allocation8_spill]] %s4489_s29  ;;  %p506_p3 = pnand %p3331_p1, %p505_p2 }
   0xc   : > { %509 = sbr.rel (%p506_p3) target bundleno = 3229 (0xc9d), region = 72 }
  0x11   : > { %p594_p4 = scmp.lt.s32.totalorder %s3758_s25, 1  ;;  %s4473_s3 = sld [smem:[#allocation10_spill]] }
  0x12   : > { %s4474_s5 = sld [smem:[#allocation11_spill]]  ;;  %p3340_p5 = scmp.ne.s32.totalorder %s3758_s25, 0 }
  0x13   : > { %s3875_s30 = scalar_select %p594_p4, %s3758_s25, 1 }
  0x15   : > { %s3403_s20 = sshll.u32 %s3875_s30, 4  ;;  %s618_s27 = scalar_lea.vmem %s4457_s7, %s3875_s30 }
  0x16   : > { %s621_s23 = scalar_lea.vmem %s4458_s8, %s3875_s30  ;;  %s637_s21 = scalar_lea.vmem %s4462_s12, %s3875_s30 }
  0x17   : > { %s3893_s15 = scalar_lea.vmem %s4473_s3, %s3403_s20  ;;  %s3915_s3 = scalar_lea.vmem %s4459_s9, %s3403_s20 }
  0x18   : > { %s3898_s26 = scalar_lea.vmem %s4474_s5, %s3403_s20  ;;  %s629_s5 = scalar_lea.vmem %s4460_s10, %s3875_s30 }
  0x19   : > { %4475 = sst [smem:[#allocation9_spill]] %s3898_s26  ;;  %s3406_s26 = sshll.u32 %s3875_s30, 6 }
  0x1a   : > { %s3925_s17 = scalar_lea.vmem %s4461_s11, %s3406_s26  ;;  %643 = sbr.rel (%p3340_p5) target bundleno = 33 (0x21), region = 76 }
  0x1f   : > { %v644_v0 = vld [vmem:[%s4450_s0] sm:$0xff]  ;;  %vm646_vm0 = vcmask 261120   ;;  %v645_v1 = vld [vmem:[%s4450_s0 + $0x8] sm:$0xff] }
  0x20   : > { %647 = vst.msk [vmem:[#allocation2] sm:$0xff] %vm646_vm0, %v644_v0  ;;  %648 = vst.msk [vmem:[#allocation2 + $0x8] sm:$0xff] %vm646_vm0, %v645_v1 }
  0x21 PF: > { %vm653_vm1 = vcmask 261120   ;;  %v3656_v16 = vld [vmem:[%s3893_s15 + $0x8] sm:$0xff]   ;;  %v3768_v17 = vmov 0.0   ;;  %vm3769_vm2 = vmmov 0   ;;  %v3657_v18 = vld [vmem:[%s3893_s15] sm:$0xff]   ;;  %s4476_s28 = scalar_lea.vmem %s4451_s1, %s3875_s30  ;;  %s4477_s16 = scalar_lea.vmem %s4452_s2, %s3875_s30  ;;  %v780_v48 = vlaneseq }
  0x22   : > { %3457 = vmatprep.subr.bf16.mxu0 %v3768_v17  ;;  %3461 = vmatprep.mubr.msk.bf16.mxu0 %vm3769_vm2, %v3768_v17  ;;  %v3341_v27 = vld [vmem:[%s4476_s28] ss:$0 sm:$0xff]  ;;  %s4478_s22 = scalar_lea.vmem %s4454_s4, %s3875_s30  ;;  %s3770_s20 = smov 112   ;;  %v3774_v46 = vmov 1983009808   ;;  %vm1215_vm3 = vcmask 64512  }
  0x23   : > { %3458 = vmatpush3.bf16.msra.mxu0 %v3656_v16  ;;  %3477 = vmatprep.subr.bf16.mxu1 %v3768_v17  ;;  %v3342_v31 = vld [vmem:[%s4477_s16] ss:$0 sm:$0xff]  ;;  %s3771_s24 = smov 120   ;;  %s3772_s14 = smov 104   ;;  %v778_v47 = vunpack.c.l.s4 %v3774_v46  ;;  %v781_v50 = vshrl.u32 %v780_v48, 7  ;;  %vm1459_vm4 = vcmask 1043456  }
  0x24   : > { %3459 = vmatprep.subr.bf16.mxu0 %v3768_v17  ;;  %3479 = vmatprep.mubr.msk.bf16.mxu1 %vm3769_vm2, %v3768_v17  ;;  %v3343_v36 = vld [vmem:[%s4478_s22] ss:$0 sm:$0xff]  ;;  %s3773_s26 = smov 96   ;;  %v3775_v51 = vmov 1934713408   ;;  %s3776_s15 = smov 64  }
  0x25   : > { %v779_v49 = vunpack.c.0.s8 %v778_v47  ;;  %v810_v52 = vunpack.c.l.s4 %v3775_v51  ;;  %s4479_s28 = sld [smem:[#allocation9_spill]]  ;;  %s3777_s29 = smov 16   ;;  %vm1790_vm5 = vcmask 130048   ;;  %vm1792_vm6 = vcmask 195584  }
  0x26   : > { %s3778_s13 = smov 8   ;;  %s3779_s16 = smov 24  }
  0x27   : > { %v649_v2 = vld [vmem:[#allocation2] sm:$0xff]  ;;  %v650_v3 = vld [vmem:[#allocation2 + $0x8] sm:$0xff]  ;;  %3460 = vmatpush3.bf16.msra.mxu0 %v3657_v18  ;;  %v3998_v55 = vsub.s32 %v779_v49, %v781_v50  ;;  %v811_v59 = vunpack.c.0.s8 %v810_v52  ;;  %s4480_s22 = scalar_lea.vmem %s4456_s6, %s3875_s30  ;;  %p3398_p6 = scmp.ne.s32.totalorder %s3758_s25, 1 }
  0x28   : > { %v654_v4 = vsel %vm653_vm1, %v649_v2, 0.0  ;;  %v657_v5 = vsel %vm653_vm1, %v650_v3, 0.0  ;;  %3465 = vmatprep.subr.bf16.mxu0 %v3768_v17 }
  0x29   : > { %655 = vadd.xlane.f32.xlu0 %v654_v4 }
  0x2d   : > { %658 = vadd.xlane.f32.xlu0 %v657_v5 }
  0xb2   : > { %v656_v6 = vpop.xlane.xlu0 %655 }
  0xb3   : > { %v661_v7 = vmul.f32 0.03125, %v656_v6 }
  0xb5   : > { %v663_v8 = vsub.f32 %v649_v2, %v661_v7  ;;  %v4008_v2 = vsub.s32 %v811_v59, %v781_v50 }
  0xb6   : > { %v659_v9 = vpop.xlane.xlu0 %658 }
  0xb7   : > { %v662_v10 = vmul.f32 0.03125, %v659_v9  ;;  %v665_v11 = vmul.f32 %v663_v8, %v663_v8 }
  0xb9   : > { %v664_v12 = vsub.f32 %v650_v3, %v662_v10  ;;  %v667_v13 = vsel %vm653_vm1, %v665_v11, 0.0 }
  0xba   : > { %668 = vadd.xlane.f32.xlu1 %v667_v13 }
  0xbb   : > { %v666_v14 = vmul.f32 %v664_v12, %v664_v12 }
  0xbd   : > { %v670_v15 = vsel %vm653_vm1, %v666_v14, 0.0 }
  0xbe   : > { %671 = vadd.xlane.f32.xlu1 %v670_v15 }
 0x143   : > { %v669_v19 = vpop.xlane.xlu1 %668 }
 0x144   : > { %v673_v20 = vmul.f32 0.03125, %v669_v19 }
 0x146   : > { %v675_v21 = vadd.f32 1e-05, %v673_v20 }
 0x147   : > { %v672_v22 = vpop.xlane.xlu1 %671 }
 0x148   : > { %3670 = vrsqrt.f32 %v675_v21  ;;  %v674_v23 = vmul.f32 0.03125, %v672_v22 }
 0x14a   : > { %v676_v24 = vadd.f32 1e-05, %v674_v23 }
 0x14c   : > { %3672 = vrsqrt.f32 %v676_v24 }
 0x155   : > { %v3671_v25 = vpop.eup %3670 }
 0x156   : > { %v679_v26 = vmul.f32 %v3671_v25, %v663_v8 }
 0x158   : > { %v687_v30 = vmul.f32 %v3341_v27, %v679_v26 }
 0x159   : > { %v3673_v28 = vpop.eup %3672 }
 0x15a   : > { %v680_v29 = vmul.f32 %v3673_v28, %v664_v12  ;;  %v695_v33 = vadd.f32 %v3342_v31, %v687_v30 }
 0x15c   : > { %v688_v32 = vmul.f32 %v3341_v27, %v680_v29 }
 0x15e   : > { %v696_v34 = vadd.f32 %v3342_v31, %v688_v32 }
 0x160   : > { %v697_v35 = vpack.c.bf16 %v696_v34, %v695_v33 }
 0x162   : > { %3462 = vmatmul.mubr.msk.bf16.vlgmr.msra.gmra.mxu0 %vm653_vm1, %v697_v35 }
 0x163   : > { %3467 = vmatprep.mubr.msk.bf16.mxu0 %vm3769_vm2, %v3768_v17 }
 0x222   : > { %v758_v37 = vpop.f32.mrf.mxu0 }
 0x223   : > { %v3970_v38 = vadd.f32 %v3343_v36, %v758_v37 }
 0x224   : > { %v3463_v39 = vpop.f32.mrf.mxu0 }
 0x225   : > { %769 = vrot.lane.b32.xlu1 %v3970_v38, %s3770_s20  ;;  %766 = vrot.lane.b32.xlu0 %v3970_v38, %s3771_s24 }
 0x226   : > { %v761_v40 = vpop.f32.mrf.mxu0 }
 0x227   : > { %v3976_v41 = vadd.f32 %v3343_v36, %v761_v40 }
 0x228   : > { %v3464_v42 = vpop.f32.mrf.mxu0 }
 0x229   : > { %772 = vrot.lane.b32.xlu1 %v3970_v38, %s3772_s14 }
 0x22d   : > { %911 = vrot.lane.b32.xlu1 %v3970_v38, %s3773_s26 }
 0x297   : > { %v3982_v43 = vpop.permute.xlu1 %769  ;;  %v3984_v44 = vpop.permute.xlu0 %766 }
 0x298   : > { %915 = vrot.lane.b32.xlu1 %v3982_v43, %s3773_s26  ;;  %913 = vrot.lane.b32.xlu0 %v3984_v44, %s3773_s26  ;;  %v775_v56 = vcombine.low %v3970_v38, %v3982_v43  ;;  %v776_v57 = vcombine.high %v3970_v38, %v3982_v43 }
 0x29a   : > { %v783_v62 = vrot.slane %v775_v56, %v3998_v55  ;;  %v790_v63 = vrot.slane %v776_v57, %v3998_v55 }
 0x29b   : > { %v3990_v45 = vpop.permute.xlu1 %772 }
 0x29c   : > { %917 = vrot.lane.b32.xlu0 %v3990_v45, %s3773_s26  ;;  %v791_v53 = vcombine.low %v3984_v44, %v3990_v45  ;;  %v792_v54 = vcombine.high %v3984_v44, %v3990_v45 }
 0x29e   : > { %v799_v60 = vrot.slane %v791_v53, %v3998_v55  ;;  %v806_v61 = vrot.slane %v792_v54, %v3998_v55 }
 0x29f   : > { %v912_v58 = vpop.permute.xlu1 %911 }
 0x2a0   : > { %v807_v3 = vcombine.low %v783_v62, %v799_v60  ;;  %v808_v4 = vcombine.high %v783_v62, %v799_v60  ;;  %v823_v5 = vcombine.low %v790_v63, %v806_v61  ;;  %v824_v6 = vcombine.high %v790_v63, %v806_v61 }
 0x2a2   : > { %v815_v12 = vrot.slane %v807_v3, %v4008_v2  ;;  %v822_v13 = vrot.slane %v808_v4, %v4008_v2  ;;  %v831_v14 = vrot.slane %v823_v5, %v4008_v2  ;;  %v838_v15 = vrot.slane %v824_v6, %v4008_v2 }
 0x2a4   : > { %v843_v25 = vcombine.low %v815_v12, %v822_v13  ;;  %v3347_v26 = vcombine.high %v815_v12, %v822_v13  ;;  %v859_v27 = vcombine.low %v831_v14, %v838_v15  ;;  %v3348_v28 = vcombine.high %v831_v14, %v838_v15 }
 0x2a6   : > { %v850_v37 = vrot.slane %v843_v25, %v3998_v55  ;;  %v858_v39 = vrot.slane %v3347_v26, %v3998_v55  ;;  %v866_v40 = vrot.slane %v859_v27, %v3998_v55  ;;  %v874_v42 = vrot.slane %v3348_v28, %v3998_v55 }
 0x2a8   : > { %v875_v54 = vcombine.low %v850_v37, %v858_v39  ;;  %v891_v56 = vcombine.low %v866_v40, %v874_v42  ;;  %v876_v57 = vcombine.high %v850_v37, %v858_v39 }
 0x2aa   : > { %v899_v3 = vrot.slane %v891_v56, %v4008_v2  ;;  %v890_v6 = vrot.slane %v876_v57, %v4008_v2 }
 0x30a   : > { %v916_v0 = vpop.permute.xlu1 %915  ;;  %v914_v1 = vpop.permute.xlu0 %913 }
 0x30b   : > { %v923_v7 = vcombine.low %v912_v58, %v916_v0  ;;  %v924_v8 = vcombine.high %v912_v58, %v916_v0  ;;  %v892_v58 = vcombine.high %v866_v40, %v874_v42 }
 0x30d   : > { %v931_v16 = vrot.slane %v923_v7, %v3998_v55  ;;  %v938_v18 = vrot.slane %v924_v8, %v3998_v55  ;;  %v906_v7 = vrot.slane %v892_v58, %v4008_v2 }
 0x30e   : > { %v918_v9 = vpop.permute.xlu0 %917 }
 0x30f   : > { %v939_v10 = vcombine.low %v914_v1, %v918_v9  ;;  %v940_v11 = vcombine.high %v914_v1, %v918_v9  ;;  %v883_v1 = vrot.slane %v875_v54, %v4008_v2  ;;  %v909_v12 = vcombine.low %v890_v6, %v906_v7 }
 0x311   : > { %v947_v19 = vrot.slane %v939_v10, %v3998_v55  ;;  %v954_v20 = vrot.slane %v940_v11, %v3998_v55  ;;  %v907_v11 = vcombine.low %v883_v1, %v899_v3  ;;  %v1209_v15 = vpack.c.bf16 %v909_v12, %v909_v12 }
 0x313   : > { %v955_v21 = vcombine.low %v931_v16, %v947_v19  ;;  %v956_v22 = vcombine.high %v931_v16, %v947_v19  ;;  %v971_v23 = vcombine.low %v938_v18, %v954_v20  ;;  %v972_v24 = vcombine.high %v938_v18, %v954_v20 }
 0x314   : > { %v1207_v14 = vpack.c.bf16 %v907_v11, %v907_v11  ;;  %v908_v19 = vcombine.high %v883_v1, %v899_v3 }
 0x315   : > { %v963_v29 = vrot.slane %v955_v21, %v4008_v2  ;;  %v970_v30 = vrot.slane %v956_v22, %v4008_v2  ;;  %v979_v31 = vrot.slane %v971_v23, %v4008_v2  ;;  %v986_v32 = vrot.slane %v972_v24, %v4008_v2 }
 0x316   : > { %v1208_v21 = vpack.c.bf16 %v908_v19, %v908_v19  ;;  %v910_v23 = vcombine.high %v890_v6, %v906_v7 }
 0x317   : > { %v991_v33 = vcombine.low %v963_v29, %v970_v30  ;;  %v3349_v34 = vcombine.high %v963_v29, %v970_v30  ;;  %v1007_v35 = vcombine.low %v979_v31, %v986_v32  ;;  %v3350_v36 = vcombine.high %v979_v31, %v986_v32 }
 0x318   : > { %v1210_v24 = vpack.c.bf16 %v910_v23, %v910_v23 }
 0x319   : > { %v998_v46 = vrot.slane %v991_v33, %v3998_v55  ;;  %v1006_v47 = vrot.slane %v3349_v34, %v3998_v55  ;;  %v1014_v48 = vrot.slane %v1007_v35, %v3998_v55  ;;  %v1022_v49 = vrot.slane %v3350_v36, %v3998_v55 }
 0x31b   : > { %v1023_v50 = vcombine.low %v998_v46, %v1006_v47  ;;  %v1039_v51 = vcombine.low %v1014_v48, %v1022_v49  ;;  %v1024_v52 = vcombine.high %v998_v46, %v1006_v47  ;;  %v1040_v53 = vcombine.high %v1014_v48, %v1022_v49 }
 0x31d   : > { %v1031_v59 = vrot.slane %v1023_v50, %v4008_v2  ;;  %v1047_v60 = vrot.slane %v1039_v51, %v4008_v2  ;;  %v1038_v61 = vrot.slane %v1024_v52, %v4008_v2  ;;  %v1054_v62 = vrot.slane %v1040_v53, %v4008_v2 }
 0x31f   : > { %v1055_v63 = vcombine.low %v1031_v59, %v1047_v60  ;;  %v1057_v0 = vcombine.low %v1038_v61, %v1054_v62  ;;  %v1056_v10 = vcombine.high %v1031_v59, %v1047_v60  ;;  %v1058_v18 = vcombine.high %v1038_v61, %v1054_v62 }
 0x321   : > { %v1211_v4 = vpack.c.bf16 %v1055_v63, %v1055_v63  ;;  %v1213_v5 = vpack.c.bf16 %v1057_v0, %v1057_v0  ;;  %v1212_v13 = vpack.c.bf16 %v1056_v10, %v1056_v10  ;;  %v1214_v20 = vpack.c.bf16 %v1058_v18, %v1058_v18 }
 0x323   : > { %v1220_v8 = vsel %vm1215_vm3, %v1211_v4, 0  ;;  %v1312_v9 = vsel %vm1215_vm3, %v1213_v5, 0  ;;  %v1266_v16 = vsel %vm1215_vm3, %v1212_v13, 0  ;;  %v1358_v22 = vsel %vm1215_vm3, %v1214_v20, 0 }
 0x324   : > { %3466 = vmatpush3.bf16.xpose.msra.mxu0 %v1220_v8  ;;  %3478 = vmatpush3.bf16.xpose.msra.mxu1 %v1312_v9 }
 0x325   : > { %3471 = vmatprep.subr.bf16.mxu0 %v3768_v17  ;;  %3489 = vmatprep.subr.bf16.mxu1 %v3768_v17 }
 0x32b   : > { %3468 = vmatmul.mubr.msk.bf16.vlgmr.msra.gmra.mxu0 %vm1215_vm3, %v1207_v14  ;;  %3480 = vmatmul.mubr.msk.bf16.vlgmr.msra.gmra.mxu1 %vm1215_vm3, %v1209_v15 }
 0x32c   : > { %3472 = vmatpush3.bf16.xpose.msra.mxu0 %v1266_v16  ;;  %3473 = vmatprep.mubr.msk.bf16.mxu0 %vm3769_vm2, %v3768_v17 }
 0x32d   : > { %3483 = vmatprep.subr.bf16.mxu0 %v3768_v17  ;;  %3491 = vmatprep.mubr.msk.bf16.mxu1 %vm3769_vm2, %v3768_v17 }
 0x333   : > { %3474 = vmatmul.mubr.msk.bf16.vlgmr.msra.gmra.mxu0 %vm1215_vm3, %v1208_v21 }
 0x334   : > { %3484 = vmatpush3.bf16.xpose.msra.mxu0 %v1358_v22  ;;  %3485 = vmatprep.mubr.msk.bf16.mxu0 %vm3769_vm2, %v3768_v17 }
 0x335   : > { %3495 = vmatprep.subr.bf16.mxu0 %v3768_v17 }
 0x33b   : > { %3486 = vmatmul.mubr.msk.bf16.vlgmr.msra.gmra.mxu0 %vm1215_vm3, %v1210_v24 }
 0x33c   : > { %3497 = vmatprep.mubr.msk.bf16.mxu0 %vm3769_vm2, %v3768_v17 }
 0x3eb   : > { %v1256_v25 = vpop.f32.mrf.mxu0  ;;  %v1348_v26 = vpop.f32.mrf.mxu1 }
 0x3ec   : > { %v1400_v27 = vmul.f32 0.35355338, %v1256_v25  ;;  %v1402_v39 = vmul.f32 0.35355338, %v1348_v26 }
 0x3ed   : > { %v3469_v28 = vpop.f32.mrf.mxu0  ;;  %v3481_v29 = vpop.f32.mrf.mxu1 }
 0x3ee   : > { %v1404_v30 = vsel %vm1215_vm3, %v1400_v27, -inf  ;;  %v1410_v47 = vsel %vm1215_vm3, %v1402_v39, -inf }
 0x3ef   : > { %v1351_v31 = vpop.f32.mrf.mxu1  ;;  %1405 = vmax.xlane.f32.xlu1 %v1404_v30  ;;  %v1259_v32 = vpop.f32.mrf.mxu0 }
 0x3f1   : > { %v3470_v33 = vpop.f32.mrf.mxu0  ;;  %v3482_v34 = vpop.f32.mrf.mxu1 }
 0x3f3   : > { %v1302_v35 = vpop.f32.mrf.mxu0 }
 0x3f4   : > { %v1401_v36 = vmul.f32 0.35355338, %v1302_v35 }
 0x3f5   : > { %v3475_v37 = vpop.f32.mrf.mxu0 }
 0x3f6   : > { %v1407_v40 = vsel %vm1215_vm3, %v1401_v36, -inf }
 0x3f7   : > { %1408 = vmax.xlane.f32.xlu0 %v1407_v40  ;;  %v1305_v42 = vpop.f32.mrf.mxu0 }
 0x3f9   : > { %v3476_v46 = vpop.f32.mrf.mxu0 }
 0x3fb   : > { %1411 = vmax.xlane.f32.xlu0 %v1410_v47  ;;  %v1394_v48 = vpop.f32.mrf.mxu0 }
 0x3fc   : > { %v1403_v49 = vmul.f32 0.35355338, %v1394_v48 }
 0x3fd   : > { %v3487_v50 = vpop.f32.mrf.mxu0 }
 0x3fe   : > { %v1413_v51 = vsel %vm1215_vm3, %v1403_v49, -inf }
 0x3ff   : > { %1414 = vmax.xlane.f32.xlu0 %v1413_v51  ;;  %v1397_v52 = vpop.f32.mrf.mxu0 }
 0x400   : > { %1795 = vrot.lane.b32.xlu1 %v3976_v41, %s3771_s24 }
 0x401   : > { %v3488_v53 = vpop.f32.mrf.mxu0 }
 0x404   : > { %1801 = vrot.lane.b32.xlu1 %v3976_v41, %s3772_s14 }
 0x408   : > { %1061 = vrot.lane.b32.xlu1 %v3984_v44, %s3776_s15 }
 0x40c   : > { %1063 = vrot.lane.b32.xlu1 %v3982_v43, %s3776_s15 }
 0x410   : > { %1065 = vrot.lane.b32.xlu1 %v3990_v45, %s3776_s15 }
 0x415   : > { %1798 = vrot.lane.b32.xlu0 %v3976_v41, %s3770_s20 }
 0x419   : > { %1059 = vrot.lane.b32.xlu0 %v3970_v38, %s3776_s15 }
 0x41d   : > { %1940 = vrot.lane.b32.xlu0 %v3976_v41, %s3773_s26 }
 0x478   : > { %v1406_v54 = vpop.xlane.xlu1 %1405 }
 0x479   : > { %v1416_v61 = vsub.f32 %v1400_v27, %v1406_v54 }
 0x47b   : > { %v1420_v0 = vmul.f32 1.442695, %v1416_v61 }
 0x47c   : > { %v4078_v56 = vpop.permute.xlu1 %1795 }
 0x47d   : > { %1942 = vrot.lane.b32.xlu1 %v4078_v56, %s3773_s26 }
 0x480   : > { %v4082_v44 = vpop.permute.xlu1 %1801  ;;  %v1409_v43 = vpop.xlane.xlu0 %1408 }
 0x481   : > { %v1417_v58 = vsub.f32 %v1401_v36, %v1409_v43 }
 0x483   : > { %v1422_v63 = vmul.f32 1.442695, %v1417_v58 }
 0x484   : > { %v1062_v57 = vpop.permute.xlu1 %1061  ;;  %v1412_v45 = vpop.xlane.xlu0 %1411 }
 0x485   : > { %v1418_v59 = vsub.f32 %v1402_v39, %v1412_v45 }
 0x487   : > { %v1424_v60 = vmul.f32 1.442695, %v1418_v59 }
 0x488   : > { %v1064_v62 = vpop.permute.xlu1 %1063  ;;  %v1415_v38 = vpop.xlane.xlu0 %1414 }
 0x489   : > { %3674 = vpow2.f32 %v1424_v60  ;;  %v1419_v1 = vsub.f32 %v1403_v49, %v1415_v38 }
 0x48a   : > { %3676 = vpow2.f32 %v1422_v63  ;;  %v1820_v63 = vcombine.low %v4078_v56, %v4082_v44 }
 0x48b   : > { %3678 = vpow2.f32 %v1420_v0  ;;  %v1426_v6 = vmul.f32 1.442695, %v1419_v1 }
 0x48c   : > { %v1066_v3 = vpop.permute.xlu1 %1065  ;;  %v4084_v4 = vpop.permute.xlu0 %1798 }
 0x48d   : > { %v1087_v5 = vcombine.low %v1062_v57, %v1066_v3  ;;  %v1088_v7 = vcombine.high %v1062_v57, %v1066_v3  ;;  %3680 = vpow2.f32 %v1426_v6  ;;  %v1804_v38 = vcombine.low %v3976_v41, %v4084_v4 }
 0x48e   : > { %v1805_v1 = vcombine.high %v3976_v41, %v4084_v4  ;;  %v1821_v6 = vcombine.high %v4078_v56, %v4082_v44 }
 0x48f   : > { %v1095_v11 = vrot.slane %v1087_v5, %v3998_v55  ;;  %v1102_v14 = vrot.slane %v1088_v7, %v3998_v55  ;;  %v1812_v5 = vrot.slane %v1804_v38, %v3998_v55  ;;  %v1828_v7 = vrot.slane %v1820_v63, %v3998_v55 }
 0x490   : > { %v1060_v8 = vpop.permute.xlu0 %1059 }
 0x491   : > { %v1071_v9 = vcombine.low %v1060_v8, %v1064_v62  ;;  %v1072_v10 = vcombine.high %v1060_v8, %v1064_v62 }
 0x493   : > { %v1079_v12 = vrot.slane %v1071_v9, %v3998_v55  ;;  %v1086_v13 = vrot.slane %v1072_v10, %v3998_v55  ;;  %v1819_v9 = vrot.slane %v1805_v1, %v3998_v55  ;;  %v1836_v10 = vcombine.low %v1812_v5, %v1828_v7 }
 0x494   : > { %v1941_v61 = vpop.permute.xlu0 %1940 }
 0x495   : > { %v1103_v15 = vcombine.low %v1079_v12, %v1095_v11  ;;  %v1104_v16 = vcombine.high %v1079_v12, %v1095_v11  ;;  %v1119_v19 = vcombine.low %v1086_v13, %v1102_v14  ;;  %v1120_v20 = vcombine.high %v1086_v13, %v1102_v14 }
 0x496   : > { %v4090_v18 = vpop.eup %3674  ;;  %v1837_v11 = vcombine.high %v1812_v5, %v1828_v7  ;;  %v1835_v12 = vrot.slane %v1821_v6, %v3998_v55 }
 0x497   : > { %v1111_v21 = vrot.slane %v1103_v15, %v4008_v2  ;;  %v1118_v22 = vrot.slane %v1104_v16, %v4008_v2  ;;  %v1127_v23 = vrot.slane %v1119_v19, %v4008_v2  ;;  %v1134_v24 = vrot.slane %v1120_v20, %v4008_v2  ;;  %v4098_v28 = vpop.eup %3676 }
 0x498   : > { %v1434_v27 = vsel %vm1215_vm3, %v4090_v18, 0.0  ;;  %v4104_v35 = vpop.eup %3678  ;;  %v1431_v36 = vsel %vm1215_vm3, %v4098_v28, 0.0  ;;  %v1852_v15 = vcombine.low %v1819_v9, %v1835_v12  ;;  %v1844_v16 = vrot.slane %v1836_v10, %v4008_v2 }
 0x499   : > { %v1139_v25 = vcombine.low %v1111_v21, %v1118_v22  ;;  %v3351_v26 = vcombine.high %v1111_v21, %v1118_v22  ;;  %v1155_v29 = vcombine.low %v1127_v23, %v1134_v24  ;;  %v3352_v30 = vcombine.high %v1127_v23, %v1134_v24  ;;  %1435 = vadd.xlane.f32.xlu0 %v1434_v27 }
 0x49a   : > { %v1428_v48 = vsel %vm1215_vm3, %v4104_v35, 0.0  ;;  %v4114_v51 = vpop.eup %3680  ;;  %v1851_v19 = vrot.slane %v1837_v11, %v4008_v2  ;;  %v1853_v20 = vcombine.high %v1819_v9, %v1835_v12 }
 0x49b   : > { %v1146_v31 = vrot.slane %v1139_v25, %v3998_v55  ;;  %v1154_v32 = vrot.slane %v3351_v26, %v3998_v55  ;;  %v1162_v33 = vrot.slane %v1155_v29, %v3998_v55  ;;  %v1170_v34 = vrot.slane %v3352_v30, %v3998_v55 }
 0x49c   : > { %v1437_v57 = vsel %vm1215_vm3, %v4114_v51, 0.0  ;;  %v1860_v26 = vrot.slane %v1852_v15, %v4008_v2  ;;  %v1867_v27 = vrot.slane %v1853_v20, %v4008_v2  ;;  %v1872_v29 = vcombine.low %v1844_v16, %v1851_v19 }
 0x49d   : > { %v1171_v37 = vcombine.low %v1146_v31, %v1154_v32  ;;  %v1172_v39 = vcombine.high %v1146_v31, %v1154_v32  ;;  %1432 = vadd.xlane.f32.xlu0 %v1431_v36  ;;  %v1187_v40 = vcombine.low %v1162_v33, %v1170_v34  ;;  %v1188_v42 = vcombine.high %v1162_v33, %v1170_v34 }
 0x49e   : > { %v3363_v36 = vcombine.high %v1844_v16, %v1851_v19 }
 0x49f   : > { %v1179_v46 = vrot.slane %v1171_v37, %v4008_v2  ;;  %v1186_v47 = vrot.slane %v1172_v39, %v4008_v2  ;;  %v1195_v49 = vrot.slane %v1187_v40, %v4008_v2  ;;  %v1202_v50 = vrot.slane %v1188_v42, %v4008_v2 }
 0x4a1   : > { %1429 = vadd.xlane.f32.xlu1 %v1428_v48  ;;  %v1203_v52 = vcombine.low %v1179_v46, %v1195_v49  ;;  %v1204_v53 = vcombine.high %v1179_v46, %v1195_v49  ;;  %v4116_v54 = vcombine.high %v1186_v47, %v1202_v50  ;;  %v4118_v43 = vcombine.low %v1186_v47, %v1202_v50 }
 0x4a2   : > { %v4154_v49 = vrot.slane %v1872_v29, %v3998_v55  ;;  %v1888_v50 = vcombine.low %v1860_v26, %v1867_v27 }
 0x4a3   : > { %v1452_v45 = vpack.c.bf16 %v1203_v52, %v1203_v52  ;;  %v1453_v58 = vpack.c.bf16 %v1204_v53, %v1204_v53  ;;  %v1455_v39 = vpack.c.bf16 %v4116_v54, %v4116_v54  ;;  %v3364_v52 = vcombine.high %v1860_v26, %v1867_v27 }
 0x4a4   : > { %v4161_v54 = vrot.slane %v3363_v36, %v3998_v55 }
 0x4a5   : > { %1438 = vadd.xlane.f32.xlu1 %v1437_v57  ;;  %v1461_v59 = vsel %vm1459_vm4, %v1452_v45, 0  ;;  %v1507_v60 = vsel %vm1459_vm4, %v1453_v58, 0  ;;  %v1903_v5 = vrot.slane %v3364_v52, %v3998_v55 }
 0x4a6   : > { %3490 = vmatpush3.bf16.msra.mxu1 %v1461_v59  ;;  %3496 = vmatpush3.bf16.msra.mxu0 %v1507_v60  ;;  %v1599_v59 = vsel %vm1459_vm4, %v1455_v39, 0 }
 0x4a7   : > { %3507 = vmatprep.subr.bf16.mxu0 %v3768_v17  ;;  %3501 = vmatprep.subr.bf16.mxu1 %v3768_v17 }
 0x4b3   : > { %1944 = vrot.lane.b32.xlu0 %v4084_v4, %s3773_s26 }
 0x4b6   : > { %1946 = vrot.lane.b32.xlu1 %v4082_v44, %s3773_s26 }
 0x4ef   : > { %v1943_v0 = vpop.permute.xlu1 %1942 }
 0x522   : > { %v1436_v62 = vpop.xlane.xlu0 %1435 }
 0x526   : > { %v1433_v3 = vpop.xlane.xlu0 %1432 }
 0x527   : > { %3682 = vrcp.f32 %v1433_v3  ;;  %v1895_v3 = vrot.slane %v1888_v50, %v3998_v55 }
 0x52a   : > { %v1430_v8 = vpop.xlane.xlu1 %1429  ;;  %v1945_v13 = vpop.permute.xlu0 %1944 }
 0x52b   : > { %3684 = vrcp.f32 %v1430_v8  ;;  %v1952_v21 = vcombine.low %v1941_v61, %v1945_v13  ;;  %v1953_v22 = vcombine.high %v1941_v61, %v1945_v13  ;;  %v1454_v61 = vpack.c.bf16 %v4118_v43, %v4118_v43 }
 0x52d   : > { %v1960_v31 = vrot.slane %v1952_v21, %v3998_v55  ;;  %v1967_v32 = vrot.slane %v1953_v22, %v3998_v55  ;;  %v1553_v10 = vsel %vm1459_vm4, %v1454_v61, 0  ;;  %v1920_v22 = vcombine.low %v1895_v3, %v1903_v5 }
 0x52e   : > { %v1439_v14 = vpop.xlane.xlu1 %1438 }
 0x52f   : > { %3686 = vrcp.f32 %v1439_v14 }
 0x530   : > { %3688 = vrcp.f32 %v1436_v62 }
 0x532   : > { %v1947_v23 = vpop.permute.xlu1 %1946 }
 0x533   : > { %v1968_v24 = vcombine.low %v1943_v0, %v1947_v23  ;;  %v1969_v25 = vcombine.high %v1943_v0, %v1947_v23 }
 0x534   : > { %v3683_v30 = vpop.eup %3682 }
 0x535   : > { %v1976_v33 = vrot.slane %v1968_v24, %v3998_v55  ;;  %v1983_v34 = vrot.slane %v1969_v25, %v3998_v55  ;;  %v1445_v37 = vmul.f32 %v3683_v30, %v4098_v28 }
 0x537   : > { %v1984_v40 = vcombine.low %v1960_v31, %v1976_v33  ;;  %v1985_v42 = vcombine.high %v1960_v31, %v1976_v33  ;;  %v2000_v46 = vcombine.low %v1967_v32, %v1983_v34  ;;  %v2001_v47 = vcombine.high %v1967_v32, %v1983_v34 }
 0x538   : > { %v3685_v48 = vpop.eup %3684  ;;  %v1449_v53 = vpack.c.bf16 %v1445_v37, %v1445_v37  ;;  %v1928_v31 = vrot.slane %v1920_v22, %v4008_v2  ;;  %v1905_v37 = vcombine.high %v4154_v49, %v4161_v54 }
 0x539   : > { %v1992_v57 = vrot.slane %v1984_v40, %v4008_v2  ;;  %v1999_v45 = vrot.slane %v1985_v42, %v4008_v2  ;;  %v2008_v28 = vrot.slane %v2000_v46, %v4008_v2  ;;  %v2015_v58 = vrot.slane %v2001_v47, %v4008_v2 }
 0x53a   : > { %3498 = vmatmul.mubr.msk.bf16.vlgmr.msra.gmra.mxu0 %vm1215_vm3, %v1449_v53  ;;  %v1444_v60 = vmul.f32 %v3685_v48, %v4104_v35  ;;  %v1921_v42 = vcombine.high %v1895_v3, %v1903_v5  ;;  %v1919_v52 = vrot.slane %v1905_v37, %v4008_v2 }
 0x53b   : > { %v2020_v62 = vcombine.low %v1992_v57, %v1999_v45  ;;  %v3365_v38 = vcombine.high %v1992_v57, %v1999_v45  ;;  %v2036_v63 = vcombine.low %v2008_v28, %v2015_v58  ;;  %v3366_v0 = vcombine.high %v2008_v28, %v2015_v58  ;;  %3508 = vmatpush3.bf16.msra.mxu0 %v1599_v59 }
 0x53c   : > { %v3687_v1 = vpop.eup %3686  ;;  %v1448_v6 = vpack.c.bf16 %v1444_v60, %v1444_v60  ;;  %3509 = vmatprep.mubr.msk.bf16.mxu0 %vm3769_vm2, %v3768_v17  ;;  %3519 = vmatprep.subr.bf16.mxu0 %v3768_v17  ;;  %v1935_v53 = vrot.slane %v1921_v42, %v4008_v2 }
 0x53d   : > { %v3689_v35 = vpop.eup %3688  ;;  %v2027_v7 = vrot.slane %v2020_v62, %v3998_v55  ;;  %v2035_v43 = vrot.slane %v3365_v38, %v3998_v55  ;;  %v2043_v8 = vrot.slane %v2036_v63, %v3998_v55  ;;  %v2051_v9 = vrot.slane %v3366_v0, %v3998_v55 }
 0x53e   : > { %3492 = vmatmul.mubr.msk.bf16.vlgmr.msra.gmra.mxu1 %vm1215_vm3, %v1448_v6  ;;  %v1447_v11 = vmul.f32 %v3687_v1, %v4114_v51  ;;  %v1446_v16 = vmul.f32 %v3689_v35, %v4090_v18  ;;  %v1904_v51 = vcombine.low %v4154_v49, %v4161_v54  ;;  %v1938_v45 = vcombine.low %v1919_v52, %v1935_v53 }
 0x53f   : > { %3502 = vmatpush3.bf16.msra.mxu1 %v1553_v10  ;;  %3503 = vmatprep.mubr.msk.bf16.mxu1 %vm3769_vm2, %v3768_v17  ;;  %v2052_v12 = vcombine.low %v2027_v7, %v2035_v43  ;;  %v2068_v13 = vcombine.low %v2043_v8, %v2051_v9  ;;  %v2053_v14 = vcombine.high %v2027_v7, %v2035_v43 }
 0x540   : > { %v1451_v15 = vpack.c.bf16 %v1447_v11, %v1447_v11  ;;  %3513 = vmatprep.subr.bf16.mxu1 %v3768_v17  ;;  %v2069_v19 = vcombine.high %v2043_v8, %v2051_v9  ;;  %v1450_v26 = vpack.c.bf16 %v1446_v16, %v1446_v16  ;;  %v1912_v30 = vrot.slane %v1904_v51, %v4008_v2 }
 0x541   : > { %v2060_v20 = vrot.slane %v2052_v12, %v4008_v2  ;;  %v2076_v21 = vrot.slane %v2068_v13, %v4008_v2  ;;  %v2067_v18 = vrot.slane %v2053_v14, %v4008_v2  ;;  %v1939_v28 = vcombine.high %v1919_v52, %v1935_v53 }
 0x542   : > { %3510 = vmatmul.mubr.msk.bf16.vlgmr.msra.gmra.mxu0 %vm1215_vm3, %v1451_v15  ;;  %v2083_v25 = vrot.slane %v2069_v19, %v4008_v2  ;;  %v1936_v39 = vcombine.low %v1912_v30, %v1928_v31  ;;  %v1937_v40 = vcombine.high %v1912_v30, %v1928_v31  ;;  %v2238_v58 = vpack.c.bf16 %v1938_v45, %v1938_v45 }
 0x543   : > { %v2084_v23 = vcombine.low %v2060_v20, %v2076_v21  ;;  %v2085_v24 = vcombine.high %v2060_v20, %v2076_v21  ;;  %3521 = vmatprep.mubr.msk.bf16.mxu0 %vm3769_vm2, %v3768_v17  ;;  %v2239_v54 = vpack.c.bf16 %v1939_v28, %v1939_v28 }
 0x544   : > { %v2086_v34 = vcombine.low %v2067_v18, %v2083_v25  ;;  %v2087_v36 = vcombine.high %v2067_v18, %v2083_v25  ;;  %v2236_v48 = vpack.c.bf16 %v1936_v39, %v1936_v39  ;;  %v2237_v50 = vpack.c.bf16 %v1937_v40, %v1937_v40 }
 0x545   : > { %v2240_v27 = vpack.c.bf16 %v2084_v23, %v2084_v23  ;;  %v2241_v29 = vpack.c.bf16 %v2085_v24, %v2085_v24 }
 0x546   : > { %3504 = vmatmul.mubr.msk.bf16.vlgmr.msra.gmra.mxu1 %vm1215_vm3, %v1450_v26  ;;  %v2242_v46 = vpack.c.bf16 %v2086_v34, %v2086_v34  ;;  %v2243_v47 = vpack.c.bf16 %v2087_v36, %v2087_v36 }
 0x547   : > { %v2248_v32 = vsel %vm1215_vm3, %v2240_v27, 0  ;;  %v2294_v33 = vsel %vm1215_vm3, %v2241_v29, 0  ;;  %3515 = vmatprep.mubr.msk.bf16.mxu1 %vm3769_vm2, %v3768_v17 }
 0x548   : > { %3514 = vmatpush3.bf16.xpose.msra.mxu1 %v2248_v32  ;;  %3520 = vmatpush3.bf16.xpose.msra.mxu0 %v2294_v33  ;;  %v2340_v49 = vsel %vm1215_vm3, %v2242_v46, 0  ;;  %v2386_v57 = vsel %vm1215_vm3, %v2243_v47, 0 }
 0x549   : > { %3525 = vmatprep.subr.bf16.mxu1 %v3768_v17  ;;  %3531 = vmatprep.subr.bf16.mxu0 %v3768_v17 }
 0x54f   : > { %3516 = vmatmul.mubr.msk.bf16.vlgmr.msra.gmra.mxu1 %vm1215_vm3, %v2236_v48  ;;  %3522 = vmatmul.mubr.msk.bf16.vlgmr.msra.gmra.mxu0 %vm1215_vm3, %v2237_v50 }
 0x550   : > { %3526 = vmatpush3.bf16.xpose.msra.mxu1 %v2340_v49  ;;  %3532 = vmatpush3.bf16.xpose.msra.mxu0 %v2386_v57 }
 0x551   : > { %3527 = vmatprep.mubr.msk.bf16.mxu1 %vm3769_vm2, %v3768_v17  ;;  %3533 = vmatprep.mubr.msk.bf16.mxu0 %vm3769_vm2, %v3768_v17 }
 0x552   : > { %3537 = vmatprep.subr.bf16.mxu1 %v3768_v17  ;;  %3543 = vmatprep.subr.bf16.mxu0 %v3768_v17 }
 0x557   : > { %3528 = vmatmul.mubr.msk.bf16.vlgmr.msra.gmra.mxu1 %vm1215_vm3, %v2238_v58  ;;  %3534 = vmatmul.mubr.msk.bf16.vlgmr.msra.gmra.mxu0 %vm1215_vm3, %v2239_v54 }
 0x558   : > { %3539 = vmatprep.mubr.msk.bf16.mxu1 %vm3769_vm2, %v3768_v17  ;;  %3545 = vmatprep.mubr.msk.bf16.mxu0 %vm3769_vm2, %v3768_v17 }
 0x5fa   : > { %v1543_v59 = vpop.f32.mrf.mxu0 }
 0x5fc   : > { %v3499_v60 = vpop.f32.mrf.mxu0 }
 0x5fe   : > { %v1546_v61 = vpop.f32.mrf.mxu0  ;;  %v1497_v62 = vpop.f32.mrf.mxu1 }
 0x600   : > { %v3500_v38 = vpop.f32.mrf.mxu0  ;;  %v3493_v63 = vpop.f32.mrf.mxu1 }
 0x602   : > { %v1500_v0 = vpop.f32.mrf.mxu1  ;;  %v1635_v1 = vpop.f32.mrf.mxu0 }
 0x603   : > { %v1657_v3 = vcombine.low %v1543_v59, %v1635_v1  ;;  %v1658_v5 = vcombine.high %v1543_v59, %v1635_v1 }
 0x604   : > { %v3494_v6 = vpop.f32.mrf.mxu1  ;;  %v3511_v35 = vpop.f32.mrf.mxu0 }
 0x605   : > { %v1665_v12 = vrot.slane %v1657_v3, %v3998_v55  ;;  %v1672_v13 = vrot.slane %v1658_v5, %v3998_v55 }
 0x606   : > { %v1589_v7 = vpop.f32.mrf.mxu1  ;;  %v1638_v43 = vpop.f32.mrf.mxu0 }
 0x607   : > { %v1641_v8 = vcombine.low %v1497_v62, %v1589_v7  ;;  %v1642_v9 = vcombine.high %v1497_v62, %v1589_v7 }
 0x608   : > { %v3505_v10 = vpop.f32.mrf.mxu1  ;;  %v3512_v11 = vpop.f32.mrf.mxu0 }
 0x609   : > { %v1649_v14 = vrot.slane %v1641_v8, %v3998_v55  ;;  %v1656_v15 = vrot.slane %v1642_v9, %v3998_v55 }
 0x60a   : > { %v1592_v16 = vpop.f32.mrf.mxu1 }
 0x60b   : > { %v1673_v19 = vcombine.low %v1649_v14, %v1665_v12  ;;  %v1674_v20 = vcombine.high %v1649_v14, %v1665_v12  ;;  %v1689_v21 = vcombine.low %v1656_v15, %v1672_v13  ;;  %v1690_v51 = vcombine.high %v1656_v15, %v1672_v13 }
 0x60c   : > { %v3506_v22 = vpop.f32.mrf.mxu1 }
 0x60d   : > { %v1681_v23 = vrot.slane %v1673_v19, %v4008_v2  ;;  %v1688_v24 = vrot.slane %v1674_v20, %v4008_v2  ;;  %v1697_v18 = vrot.slane %v1689_v21, %v4008_v2  ;;  %v1704_v25 = vrot.slane %v1690_v51, %v4008_v2 }
 0x60f   : > { %v1709_v26 = vcombine.low %v1681_v23, %v1688_v24  ;;  %v3361_v27 = vcombine.high %v1681_v23, %v1688_v24  ;;  %v1725_v29 = vcombine.low %v1697_v18, %v1704_v25  ;;  %v3362_v30 = vcombine.high %v1697_v18, %v1704_v25  ;;  %v2284_v31 = vpop.f32.mrf.mxu1  ;;  %v2330_v32 = vpop.f32.mrf.mxu0 }
 0x610   : > { %v2428_v33 = vmul.f32 0.35355338, %v2284_v31  ;;  %v2429_v34 = vmul.f32 0.35355338, %v2330_v32 }
 0x611   : > { %v1716_v36 = vrot.slane %v1709_v26, %v3998_v55  ;;  %v1724_v37 = vrot.slane %v3361_v27, %v3998_v55  ;;  %v1732_v39 = vrot.slane %v1725_v29, %v3998_v55  ;;  %v1740_v40 = vrot.slane %v3362_v30, %v3998_v55  ;;  %v3517_v42 = vpop.f32.mrf.mxu1  ;;  %v3523_v46 = vpop.f32.mrf.mxu0 }
 0x612   : > { %v2432_v47 = vsel %vm1215_vm3, %v2428_v33, -inf  ;;  %v2435_v48 = vsel %vm1215_vm3, %v2429_v34, -inf }
 0x613   : > { %2433 = vmax.xlane.f32.xlu0 %v2432_v47  ;;  %v2287_v50 = vpop.f32.mrf.mxu1  ;;  %2436 = vmax.xlane.f32.xlu1 %v2435_v48  ;;  %v2333_v52 = vpop.f32.mrf.mxu0  ;;  %v1742_v53 = vcombine.high %v1716_v36, %v1724_v37  ;;  %v1758_v49 = vcombine.high %v1732_v39, %v1740_v40  ;;  %v1741_v57 = vcombine.low %v1716_v36, %v1724_v37 }
 0x614   : > { %v1757_v45 = vcombine.low %v1732_v39, %v1740_v40 }
 0x615   : > { %v3518_v28 = vpop.f32.mrf.mxu1  ;;  %v3524_v58 = vpop.f32.mrf.mxu0  ;;  %v4237_v54 = vrot.slane %v1742_v53, %v4008_v2  ;;  %v4240_v59 = vrot.slane %v1758_v49, %v4008_v2  ;;  %v4243_v60 = vrot.slane %v1741_v57, %v4008_v2 }
 0x616   : > { %v4246_v61 = vrot.slane %v1757_v45, %v4008_v2 }
 0x617   : > { %v2376_v62 = vpop.f32.mrf.mxu1  ;;  %v2422_v38 = vpop.f32.mrf.mxu0  ;;  %v1775_v63 = vcombine.low %v4237_v54, %v4240_v59  ;;  %v1776_v0 = vcombine.high %v4237_v54, %v4240_v59 }
 0x618   : > { %v2430_v1 = vmul.f32 0.35355338, %v2376_v62  ;;  %v1773_v3 = vcombine.low %v4243_v60, %v4246_v61  ;;  %v1774_v5 = vcombine.high %v4243_v60, %v4246_v61  ;;  %v2431_v7 = vmul.f32 0.35355338, %v2422_v38  ;;  %v3379_v60 = vld [vmem:[%s4480_s22] ss:$0 sm:$0xff] }
 0x619   : > { %v3529_v6 = vpop.f32.mrf.mxu1  ;;  %v3535_v35 = vpop.f32.mrf.mxu0 }
 0x61a   : > { %v2438_v43 = vsel %vm1215_vm3, %v2430_v1, -inf  ;;  %v2441_v12 = vsel %vm1215_vm3, %v2431_v7, -inf }
 0x61b   : > { %2439 = vmax.xlane.f32.xlu0 %v2438_v43  ;;  %v2379_v8 = vpop.f32.mrf.mxu1  ;;  %v2425_v9 = vpop.f32.mrf.mxu0 }
 0x61d   : > { %v3530_v10 = vpop.f32.mrf.mxu1  ;;  %v3536_v11 = vpop.f32.mrf.mxu0 }
 0x61f   : > { %2442 = vmax.xlane.f32.xlu0 %v2441_v12 }
 0x624   : > { %2090 = vrot.lane.b32.xlu1 %v4078_v56, %s3776_s15 }
 0x628   : > { %2092 = vrot.lane.b32.xlu1 %v4084_v4, %s3776_s15 }
 0x69c   : > { %v2434_v13 = vpop.xlane.xlu0 %2433  ;;  %v2437_v14 = vpop.xlane.xlu1 %2436 }
 0x69d   : > { %v2444_v15 = vsub.f32 %v2428_v33, %v2434_v13  ;;  %v2445_v16 = vsub.f32 %v2429_v34, %v2437_v14 }
 0x69f   : > { %v2448_v19 = vmul.f32 1.442695, %v2444_v15  ;;  %v2450_v20 = vmul.f32 1.442695, %v2445_v16 }
 0x6a1   : > { %3690 = vpow2.f32 %v2448_v19 }
 0x6a2   : > { %3692 = vpow2.f32 %v2450_v20 }
 0x6a4   : > { %v2440_v4 = vpop.xlane.xlu0 %2439 }
 0x6a5   : > { %v2446_v24 = vsub.f32 %v2430_v1, %v2440_v4 }
 0x6a7   : > { %v2452_v25 = vmul.f32 1.442695, %v2446_v24 }
 0x6a8   : > { %v2443_v23 = vpop.xlane.xlu0 %2442 }
 0x6a9   : > { %v2447_v18 = vsub.f32 %v2431_v7, %v2443_v23  ;;  %3694 = vpow2.f32 %v2452_v25 }
 0x6ab   : > { %v2454_v26 = vmul.f32 1.442695, %v2447_v18 }
 0x6ad   : > { %3696 = vpow2.f32 %v2454_v26 }
 0x6ae   : > { %v4262_v21 = vpop.eup %3690 }
 0x6af   : > { %v4264_v51 = vpop.eup %3692  ;;  %v2456_v22 = vsel %vm1215_vm3, %v4262_v21, 0.0 }
 0x6b0   : > { %v2459_v56 = vsel %vm1215_vm3, %v4264_v51, 0.0  ;;  %2457 = vadd.xlane.f32.xlu0 %v2456_v22 }
 0x6b1   : > { %2460 = vadd.xlane.f32.xlu1 %v2459_v56 }
 0x6b6   : > { %v4274_v27 = vpop.eup %3694 }
 0x6b7   : > { %v2462_v30 = vsel %vm1215_vm3, %v4274_v27, 0.0 }
 0x6ba   : > { %v4276_v29 = vpop.eup %3696 }
 0x6c2   : > { %2094 = vrot.lane.b32.xlu1 %v4082_v44, %s3776_s15  ;;  %v2465_v44 = vsel %vm1215_vm3, %v4276_v29, 0.0 }
 0x6c6   : > { %2088 = vrot.lane.b32.xlu0 %v3976_v41, %s3776_s15  ;;  %v2091_v41 = vpop.permute.xlu1 %2090 }
 0x6ca   : > { %v2093_v31 = vpop.permute.xlu1 %2092 }
 0x6e5   : > { %2463 = vadd.xlane.f32.xlu0 %v2462_v30 }
 0x6e6   : > { %2466 = vadd.xlane.f32.xlu1 %v2465_v44 }
 0x739   : > { %v2458_v32 = vpop.xlane.xlu0 %2457 }
 0x73a   : > { %v2461_v33 = vpop.xlane.xlu1 %2460  ;;  %3698 = vrcp.f32 %v2458_v32 }
 0x73b   : > { %3700 = vrcp.f32 %v2461_v33 }
 0x73d   : > { %v2089_v34 = vpop.permute.xlu0 %2088 }
 0x73e   : > { %v2095_v36 = vpop.permute.xlu1 %2094  ;;  %v2100_v37 = vcombine.low %v2089_v34, %v2093_v31  ;;  %v2101_v39 = vcombine.high %v2089_v34, %v2093_v31 }
 0x73f   : > { %v2116_v40 = vcombine.low %v2091_v41, %v2095_v36  ;;  %v2117_v42 = vcombine.high %v2091_v41, %v2095_v36 }
 0x740   : > { %v2108_v46 = vrot.slane %v2100_v37, %v3998_v55  ;;  %v2115_v47 = vrot.slane %v2101_v39, %v3998_v55 }
 0x741   : > { %v2124_v48 = vrot.slane %v2116_v40, %v3998_v55  ;;  %v2131_v50 = vrot.slane %v2117_v42, %v3998_v55 }
 0x743   : > { %v2132_v52 = vcombine.low %v2108_v46, %v2124_v48  ;;  %v2133_v53 = vcombine.high %v2108_v46, %v2124_v48  ;;  %v2148_v49 = vcombine.low %v2115_v47, %v2131_v50  ;;  %v2149_v57 = vcombine.high %v2115_v47, %v2131_v50 }
 0x745   : > { %v2140_v45 = vrot.slane %v2132_v52, %v4008_v2  ;;  %v2147_v28 = vrot.slane %v2133_v53, %v4008_v2  ;;  %v2156_v58 = vrot.slane %v2148_v49, %v4008_v2  ;;  %v2163_v62 = vrot.slane %v2149_v57, %v4008_v2 }
 0x747   : > { %v2168_v38 = vcombine.low %v2140_v45, %v2147_v28  ;;  %v3367_v1 = vcombine.high %v2140_v45, %v2147_v28  ;;  %v2184_v6 = vcombine.low %v2156_v58, %v2163_v62  ;;  %v3368_v35 = vcombine.high %v2156_v58, %v2163_v62  ;;  %v3699_v14 = vpop.eup %3698 }
 0x748   : > { %v3701_v22 = vpop.eup %3700  ;;  %v2472_v26 = vmul.f32 %v3699_v14, %v4262_v21 }
 0x749   : > { %v2175_v7 = vrot.slane %v2168_v38, %v3998_v55  ;;  %v2183_v43 = vrot.slane %v3367_v1, %v3998_v55  ;;  %v2191_v8 = vrot.slane %v2184_v6, %v3998_v55  ;;  %v2199_v9 = vrot.slane %v3368_v35, %v3998_v55 }
 0x74a   : > { %v2473_v30 = vmul.f32 %v3701_v22, %v4264_v51  ;;  %v2476_v33 = vpack.c.bf16 %v2472_v26, %v2472_v26 }
 0x74b   : > { %v2200_v10 = vcombine.low %v2175_v7, %v2183_v43  ;;  %v2216_v11 = vcombine.low %v2191_v8, %v2199_v9  ;;  %v2201_v12 = vcombine.high %v2175_v7, %v2183_v43  ;;  %v2217_v13 = vcombine.high %v2191_v8, %v2199_v9 }
 0x74c   : > { %v2477_v34 = vpack.c.bf16 %v2473_v30, %v2473_v30  ;;  %v3658_v30 = vld [vmem:[%s4479_s28 + $0x8] sm:$0xff]  }
 0x74d   : > { %v2208_v15 = vrot.slane %v2200_v10, %v4008_v2  ;;  %v2224_v16 = vrot.slane %v2216_v11, %v4008_v2  ;;  %v2215_v19 = vrot.slane %v2201_v12, %v4008_v2  ;;  %v2231_v20 = vrot.slane %v2217_v13, %v4008_v2 }
 0x74f   : > { %v2232_v56 = vcombine.low %v2208_v15, %v2224_v16  ;;  %v2233_v4 = vcombine.high %v2208_v15, %v2224_v16  ;;  %v2234_v23 = vcombine.low %v2215_v19, %v2231_v20  ;;  %v2235_v24 = vcombine.high %v2215_v19, %v2231_v20 }
 0x751   : > { %v2480_v18 = vpack.c.bf16 %v2232_v56, %v2232_v56  ;;  %v2481_v25 = vpack.c.bf16 %v2233_v4, %v2233_v4  ;;  %v2482_v31 = vpack.c.bf16 %v2234_v23, %v2234_v23  ;;  %v2483_v32 = vpack.c.bf16 %v2235_v24, %v2235_v24 }
 0x753   : > { %v2488_v44 = vsel %vm1459_vm4, %v2480_v18, 0  ;;  %v2534_v41 = vsel %vm1459_vm4, %v2481_v25, 0  ;;  %v2580_v21 = vsel %vm1459_vm4, %v2482_v31, 0  ;;  %v2626_v51 = vsel %vm1459_vm4, %v2483_v32, 0 }
 0x754   : > { %3538 = vmatpush3.bf16.msra.mxu1 %v2488_v44  ;;  %3544 = vmatpush3.bf16.msra.mxu0 %v2534_v41 }
 0x755   : > { %3549 = vmatprep.subr.bf16.mxu1 %v3768_v17  ;;  %3555 = vmatprep.subr.bf16.mxu0 %v3768_v17 }
 0x757   : > { %3540 = vmatmul.mubr.msk.bf16.vlgmr.msra.gmra.mxu1 %vm1215_vm3, %v2476_v33  ;;  %3546 = vmatmul.mubr.msk.bf16.vlgmr.msra.gmra.mxu0 %vm1215_vm3, %v2477_v34 }
 0x758   : > { %3550 = vmatpush3.bf16.msra.mxu1 %v2580_v21  ;;  %3556 = vmatpush3.bf16.msra.mxu0 %v2626_v51 }
 0x759   : > { %3551 = vmatprep.mubr.msk.bf16.mxu1 %vm3769_vm2, %v3768_v17  ;;  %3557 = vmatprep.mubr.msk.bf16.mxu0 %vm3769_vm2, %v3768_v17 }
 0x75a   : > { %3561 = vmatprep.subr.bf16.mxu1 %v3768_v17  ;;  %3569 = vmatprep.subr.bf16.mxu0 %v3768_v17 }
 0x76e   : > { %v2464_v36 = vpop.xlane.xlu0 %2463 }
 0x76f   : > { %v2467_v37 = vpop.xlane.xlu1 %2466  ;;  %3702 = vrcp.f32 %v2464_v36 }
 0x770   : > { %3704 = vrcp.f32 %v2467_v37 }
 0x77c   : > { %v3703_v39 = vpop.eup %3702 }
 0x77d   : > { %v3705_v40 = vpop.eup %3704  ;;  %v2474_v42 = vmul.f32 %v3703_v39, %v4274_v27 }
 0x77e   : > { %v2475_v46 = vmul.f32 %v3705_v40, %v4276_v29 }
 0x77f   : > { %v2478_v47 = vpack.c.bf16 %v2474_v42, %v2474_v42  ;;  %v3659_v42 = vld [vmem:[%s4479_s28] sm:$0xff]  }
 0x780   : > { %v2479_v48 = vpack.c.bf16 %v2475_v46, %v2475_v46 }
 0x781   : > { %3552 = vmatmul.mubr.msk.bf16.vlgmr.msra.gmra.mxu1 %vm1215_vm3, %v2478_v47 }
 0x782   : > { %3558 = vmatmul.mubr.msk.bf16.vlgmr.msra.gmra.mxu0 %vm1215_vm3, %v2479_v48  ;;  %3565 = vmatprep.mubr.msk.bf16.mxu1 %vm3769_vm2, %v3768_v17 }
 0x783   : > { %3573 = vmatprep.mubr.msk.bf16.mxu0 %vm3769_vm2, %v3768_v17  ;;  %3562 = vmatpush3.bf16.msra.mxu1 %v3658_v30 }
 0x784   : > { %3563 = vmatprep.subr.bf16.mxu1 %v3768_v17 }
 0x787   : > { %3564 = vmatpush3.bf16.msra.mxu1 %v3659_v42 }
 0x788   : > { %3577 = vmatprep.subr.bf16.mxu1 %v3768_v17 }
 0x817   : > { %v2524_v50 = vpop.f32.mrf.mxu1  ;;  %v2570_v52 = vpop.f32.mrf.mxu0 }
 0x819   : > { %v3541_v53 = vpop.f32.mrf.mxu1  ;;  %v3547_v49 = vpop.f32.mrf.mxu0 }
 0x81b   : > { %v2527_v57 = vpop.f32.mrf.mxu1  ;;  %v2573_v27 = vpop.f32.mrf.mxu0 }
 0x81d   : > { %v3542_v45 = vpop.f32.mrf.mxu1  ;;  %v3548_v29 = vpop.f32.mrf.mxu0 }
 0x841   : > { %v2616_v28 = vpop.f32.mrf.mxu1 }
 0x842   : > { %v2668_v58 = vcombine.low %v2524_v50, %v2616_v28  ;;  %v2669_v62 = vcombine.high %v2524_v50, %v2616_v28  ;;  %v2662_v38 = vpop.f32.mrf.mxu0 }
 0x843   : > { %v2684_v1 = vcombine.low %v2570_v52, %v2662_v38  ;;  %v2685_v6 = vcombine.high %v2570_v52, %v2662_v38  ;;  %v3553_v35 = vpop.f32.mrf.mxu1 }
 0x844   : > { %v2676_v7 = vrot.slane %v2668_v58, %v3998_v55  ;;  %v2683_v43 = vrot.slane %v2669_v62, %v3998_v55  ;;  %v3559_v8 = vpop.f32.mrf.mxu0  ;;  %v3714_v35 = vld [vmem:[#allocation2] sm:$0xff] }
 0x845   : > { %v2692_v9 = vrot.slane %v2684_v1, %v3998_v55  ;;  %v2699_v10 = vrot.slane %v2685_v6, %v3998_v55  ;;  %v2619_v11 = vpop.f32.mrf.mxu1 }
 0x846   : > { %v2665_v12 = vpop.f32.mrf.mxu0  ;;  %v3715_v11 = vld [vmem:[#allocation2 + $0x8] sm:$0xff] }
 0x847   : > { %v2700_v13 = vcombine.low %v2676_v7, %v2692_v9  ;;  %v2701_v14 = vcombine.high %v2676_v7, %v2692_v9  ;;  %v2716_v15 = vcombine.low %v2683_v43, %v2699_v10  ;;  %v2717_v16 = vcombine.high %v2683_v43, %v2699_v10  ;;  %v3554_v19 = vpop.f32.mrf.mxu1 }
 0x848   : > { %v3560_v20 = vpop.f32.mrf.mxu0 }
 0x849   : > { %v2708_v22 = vrot.slane %v2700_v13, %v4008_v2  ;;  %v2715_v56 = vrot.slane %v2701_v14, %v4008_v2  ;;  %v2724_v4 = vrot.slane %v2716_v15, %v4008_v2  ;;  %v2731_v23 = vrot.slane %v2717_v16, %v4008_v2 }
 0x84b   : > { %v2736_v24 = vcombine.low %v2708_v22, %v2715_v56  ;;  %v3377_v18 = vcombine.high %v2708_v22, %v2715_v56  ;;  %v2752_v25 = vcombine.low %v2724_v4, %v2731_v23  ;;  %v3378_v26 = vcombine.high %v2724_v4, %v2731_v23 }
 0x84d   : > { %v2743_v44 = vrot.slane %v2736_v24, %v3998_v55  ;;  %v2751_v41 = vrot.slane %v3377_v18, %v3998_v55  ;;  %v2759_v31 = vrot.slane %v2752_v25, %v3998_v55  ;;  %v2767_v32 = vrot.slane %v3378_v26, %v3998_v55  ;;  %v3660_v18 = vld [vmem:[%s3915_s3 + $0x8] sm:$0xff]   ;;  %v3661_v25 = vld [vmem:[%s3915_s3] sm:$0xff]  }
 0x84e   : > { %3570 = vmatpush3.bf16.msra.mxu0 %v3660_v18 }
 0x84f   : > { %v2769_v33 = vcombine.high %v2743_v44, %v2751_v41  ;;  %v2785_v34 = vcombine.high %v2759_v31, %v2767_v32  ;;  %v2768_v21 = vcombine.low %v2743_v44, %v2751_v41  ;;  %v2784_v51 = vcombine.low %v2759_v31, %v2767_v32  ;;  %3571 = vmatprep.subr.bf16.mxu0 %v3768_v17 }
 0x851   : > { %v2783_v36 = vrot.slane %v2769_v33, %v4008_v2  ;;  %v2799_v37 = vrot.slane %v2785_v34, %v4008_v2  ;;  %v2776_v39 = vrot.slane %v2768_v21, %v4008_v2  ;;  %v2792_v40 = vrot.slane %v2784_v51, %v4008_v2  ;;  %v3383_v21 = vld [vmem:[%s618_s27] ss:$0 sm:$0xff] }
 0x852   : > { %3572 = vmatpush3.bf16.msra.mxu0 %v3661_v25 }
 0x853   : > { %v2802_v46 = vcombine.low %v2783_v36, %v2799_v37  ;;  %v2801_v47 = vcombine.high %v2776_v39, %v2792_v40  ;;  %v2800_v48 = vcombine.low %v2776_v39, %v2792_v40  ;;  %v2803_v52 = vcombine.high %v2783_v36, %v2799_v37  ;;  %v3384_v39 = vld [vmem:[%s621_s23] ss:$0 sm:$0xff] }
 0x855   : > { %v3646_v55 = vpack.i.bf16 %v2802_v46, %v1775_v63  ;;  %v3641_v50 = vpack.i.bf16 %v2801_v47, %v1774_v5  ;;  %v3651_v2 = vpack.i.bf16 %v2803_v52, %v1776_v0  ;;  %v3665_v52 = vld [vmem:[%s3925_s17 + $0x20] sm:$0xff]  }
 0x857   : > { %3647 = vrot.lane.b32.xlu1 %v3646_v55, %s3777_s29  ;;  %3642 = vrot.lane.b32.xlu0 %v3641_v50, %s3778_s13  ;;  %v3663_v55 = vld [vmem:[%s3925_s17 + $0x30] sm:$0xff]   ;;  %v3664_v50 = vld [vmem:[%s3925_s17 + $0x28] sm:$0xff]  }
 0x85b   : > { %3652 = vrot.lane.b32.xlu0 %v3651_v2, %s3779_s16  ;;  %v3666_v2 = vld [vmem:[%s3925_s17 + $0x18] sm:$0xff]  }
 0x8c9   : > { %v3648_v53 = vpop.permute.xlu1 %3647  ;;  %v3643_v49 = vpop.permute.xlu0 %3642 }
 0x8ca   : > { %v3645_v57 = vunpack.i.h.bf16 %v3643_v49  ;;  %v3644_v63 = vunpack.i.l.bf16 %v3643_v49  ;;  %v3650_v27 = vunpack.i.h.bf16 %v3648_v53  ;;  %v3649_v45 = vunpack.i.l.bf16 %v3648_v53  ;;  %v3667_v53 = vld [vmem:[%s3925_s17 + $0x10] sm:$0xff]   ;;  %v3668_v49 = vld [vmem:[%s3925_s17 + $0x8] sm:$0xff]  }
 0x8cc   : > { %v1789_v5 = vsel %vm1215_vm3, %v1773_v3, %v3644_v63  ;;  %v2816_v29 = vsel %vm1215_vm3, %v2800_v48, %v3645_v57  ;;  %v3662_v48 = vld [vmem:[%s3925_s17 + $0x38] sm:$0xff]   ;;  %v3669_v57 = vld [vmem:[%s3925_s17] sm:$0xff]  }
 0x8cd   : > { %v3653_v54 = vpop.permute.xlu0 %3652  ;;  %v1791_v28 = vsel %vm1790_vm5, %v1789_v5, %v3649_v45  ;;  %v2817_v58 = vsel %vm1790_vm5, %v2816_v29, %v3650_v27  ;;  %v3385_v63 = vld [vmem:[%s629_s5] ss:$0 sm:$0xff] }
 0x8ce   : > { %v3655_v59 = vunpack.i.h.bf16 %v3653_v54  ;;  %v3654_v0 = vunpack.i.l.bf16 %v3653_v54 }
 0x8d0   : > { %v1793_v62 = vsel %vm1792_vm6, %v1791_v28, %v3654_v0  ;;  %v2818_v38 = vsel %vm1792_vm6, %v2817_v58, %v3655_v59 }
 0x8d1   : > { %v2819_v1 = vpack.c.bf16 %v2818_v38, %v1793_v62 }
 0x8d3   : > { %3566 = vmatmul.mubr.msk.bf16.vlgmr.msra.gmra.mxu1 %vm653_vm1, %v2819_v1 }
 0x8d4   : > { %3593 = vmatprep.mubr.msk.bf16.mxu1 %vm3769_vm2, %v3768_v17  ;;  %3578 = vmatpush3.bf16.msra.mxu1 %v3662_v48 }
 0x8d5   : > { %3579 = vmatprep.subr.bf16.mxu1 %v3768_v17 }
 0x8d8   : > { %3580 = vmatpush3.bf16.msra.mxu1 %v3663_v55 }
 0x8d9   : > { %3581 = vmatprep.subr.bf16.mxu1 %v3768_v17 }
 0x8dc   : > { %3582 = vmatpush3.bf16.msra.mxu1 %v3664_v50 }
 0x8dd   : > { %3583 = vmatprep.subr.bf16.mxu1 %v3768_v17 }
 0x8e0   : > { %3584 = vmatpush3.bf16.msra.mxu1 %v3665_v52 }
 0x8e1   : > { %3585 = vmatprep.subr.bf16.mxu1 %v3768_v17 }
 0x8e4   : > { %3586 = vmatpush3.bf16.msra.mxu1 %v3666_v2 }
 0x8e5   : > { %3587 = vmatprep.subr.bf16.mxu1 %v3768_v17 }
 0x8e8   : > { %3588 = vmatpush3.bf16.msra.mxu1 %v3667_v53 }
 0x8e9   : > { %3589 = vmatprep.subr.bf16.mxu1 %v3768_v17 }
 0x8ec   : > { %3590 = vmatpush3.bf16.msra.mxu1 %v3668_v49 }
 0x8ed   : > { %3591 = vmatprep.subr.bf16.mxu1 %v3768_v17 }
 0x8f0   : > { %3592 = vmatpush3.bf16.msra.mxu1 %v3669_v57 }
 0x993   : > { %v2880_v61 = vpop.f32.mrf.mxu1 }
 0x994   : > { %v2881_v3 = vadd.f32 %v3379_v60, %v2880_v61 }
 0x995   : > { %v3567_v6 = vpop.f32.mrf.mxu1 }
 0x996   : > { %v4365_v7 = vadd.f32 %v3714_v35, %v2881_v3 }
 0x997   : > { %v2883_v43 = vpop.f32.mrf.mxu1 }
 0x998   : > { %v2884_v8 = vadd.f32 %v3379_v60, %v2883_v43  ;;  %v2891_v9 = vsel %vm653_vm1, %v4365_v7, 0.0 }
 0x999   : > { %2892 = vadd.xlane.f32.xlu1 %v2891_v9  ;;  %v3568_v10 = vpop.f32.mrf.mxu1 }
 0x99a   : > { %v4369_v12 = vadd.f32 %v3715_v11, %v2884_v8 }
 0x99c   : > { %v2894_v13 = vsel %vm653_vm1, %v4369_v12, 0.0 }
 0x99d   : > { %2895 = vadd.xlane.f32.xlu0 %v2894_v13 }
 0xa22   : > { %v2893_v14 = vpop.xlane.xlu1 %2892 }
 0xa23   : > { %v2897_v15 = vmul.f32 0.03125, %v2893_v14 }
 0xa25   : > { %v2899_v16 = vsub.f32 %v4365_v7, %v2897_v15  ;;  %v3389_v15 = vld [vmem:[%s637_s21] ss:$0 sm:$0xff] }
 0xa26   : > { %v2896_v19 = vpop.xlane.xlu0 %2895 }
 0xa27   : > { %v2898_v20 = vmul.f32 0.03125, %v2896_v19  ;;  %v2901_v22 = vmul.f32 %v2899_v16, %v2899_v16 }
 0xa29   : > { %v2900_v56 = vsub.f32 %v4369_v12, %v2898_v20  ;;  %v2903_v4 = vsel %vm653_vm1, %v2901_v22, 0.0 }
 0xa2a   : > { %2904 = vadd.xlane.f32.xlu0 %v2903_v4 }
 0xa2b   : > { %v2902_v23 = vmul.f32 %v2900_v56, %v2900_v56 }
 0xa2d   : > { %v2906_v24 = vsel %vm653_vm1, %v2902_v23, 0.0 }
 0xa2e   : > { %2907 = vadd.xlane.f32.xlu0 %v2906_v24 }
 0xab3   : > { %v2905_v26 = vpop.xlane.xlu0 %2904 }
 0xab4   : > { %v2909_v30 = vmul.f32 0.03125, %v2905_v26 }
 0xab6   : > { %v2911_v44 = vadd.f32 1e-05, %v2909_v30 }
 0xab7   : > { %v2908_v41 = vpop.xlane.xlu0 %2907 }
 0xab8   : > { %3706 = vrsqrt.f32 %v2911_v44  ;;  %v2910_v31 = vmul.f32 0.03125, %v2908_v41 }
 0xaba   : > { %v2912_v32 = vadd.f32 1e-05, %v2910_v31 }
 0xabc   : > { %3708 = vrsqrt.f32 %v2912_v32 }
 0xac5   : > { %v3707_v33 = vpop.eup %3706 }
 0xac6   : > { %v2915_v34 = vmul.f32 %v3707_v33, %v2899_v16 }
 0xac8   : > { %v2923_v37 = vmul.f32 %v3383_v21, %v2915_v34 }
 0xac9   : > { %v3709_v51 = vpop.eup %3708 }
 0xaca   : > { %v2916_v36 = vmul.f32 %v3709_v51, %v2900_v56  ;;  %v2931_v42 = vadd.f32 %v3384_v39, %v2923_v37 }
 0xacc   : > { %v2924_v40 = vmul.f32 %v3383_v21, %v2916_v36 }
 0xace   : > { %v2932_v46 = vadd.f32 %v3384_v39, %v2924_v40 }
 0xad0   : > { %v2933_v47 = vpack.c.bf16 %v2932_v46, %v2931_v42 }
 0xad2   : > { %3574 = vmatmul.mubr.msk.bf16.vlgmr.msra.gmra.mxu0 %vm653_vm1, %v2933_v47 }
 0xb92   : > { %v2994_v27 = vpop.f32.mrf.mxu0 }
 0xb93   : > { %v2995_v45 = vadd.f32 %v3385_v63, %v2994_v27 }
 0xb94   : > { %v3575_v5 = vpop.f32.mrf.mxu0 }
 0xb95   : > { %v3001_v29 = vmul.f32 %v2995_v45, %v2995_v45 }
 0xb96   : > { %v2997_v54 = vpop.f32.mrf.mxu0 }
 0xb97   : > { %v3003_v59 = vmul.f32 %v3001_v29, %v2995_v45  ;;  %v2998_v0 = vadd.f32 %v3385_v63, %v2997_v54 }
 0xb98   : > { %v3576_v28 = vpop.f32.mrf.mxu0 }
 0xb99   : > { %v3005_v58 = vmul.f32 0.044715, %v3003_v59  ;;  %v3002_v62 = vmul.f32 %v2998_v0, %v2998_v0 }
 0xb9b   : > { %v3007_v38 = vadd.f32 %v3005_v58, %v2995_v45  ;;  %v3004_v1 = vmul.f32 %v3002_v62, %v2998_v0 }
 0xb9d   : > { %v3009_v60 = vmul.f32 0.7978846, %v3007_v38  ;;  %v3006_v17 = vmul.f32 0.044715, %v3004_v1 }
 0xb9f   : > { %3710 = vtanh.f32 %v3009_v60  ;;  %v3008_v61 = vadd.f32 %v3006_v17, %v2998_v0 }
 0xba1   : > { %v3010_v3 = vmul.f32 0.7978846, %v3008_v61 }
 0xba3   : > { %3712 = vtanh.f32 %v3010_v3 }
 0xbac   : > { %v3711_v6 = vpop.eup %3710 }
 0xbad   : > { %v3013_v35 = vadd.f32 1.0, %v3711_v6 }
 0xbaf   : > { %v3015_v8 = vmul.f32 0.5, %v3013_v35 }
 0xbb0   : > { %v3713_v43 = vpop.eup %3712 }
 0xbb1   : > { %v3014_v9 = vadd.f32 1.0, %v3713_v43  ;;  %v3017_v11 = vmul.f32 %v3015_v8, %v2995_v45 }
 0xbb3   : > { %v3016_v10 = vmul.f32 0.5, %v3014_v9 }
 0xbb5   : > { %v3018_v13 = vmul.f32 %v3016_v10, %v2998_v0 }
 0xbb7   : > { %v3019_v14 = vpack.c.bf16 %v3018_v13, %v3017_v11 }
 0xbb9   : > { %3594 = vmatmul.mubr.bf16.vlgmr.msra.gmra.mxu1 %v3019_v14 }
 0xc79   : > { %v3125_v16 = vpop.f32.mrf.mxu1 }
 0xc7a   : > { %v3126_v19 = vadd.f32 %v3389_v15, %v3125_v16 }
 0xc7b   : > { %v3595_v20 = vpop.f32.mrf.mxu1 }
 0xc7c   : > { %v3132_v22 = vadd.f32 %v3126_v19, %v4365_v7 }
 0xc7d   : > { %v3128_v56 = vpop.f32.mrf.mxu1 }
 0xc7e   : > { %3134 = vst.msk [vmem:[#allocation2] sm:$0xff] %vm653_vm1, %v3132_v22  ;;  %v3129_v4 = vadd.f32 %v3389_v15, %v3128_v56  ;;  %3139 = sbr.rel (%p3398_p6) target bundleno = 3204 (0xc84), region = 80 }
 0xc7f   : > { %v3596_v23 = vpop.f32.mrf.mxu1 }
 0xc80   : > { %v3133_v24 = vadd.f32 %v3129_v4, %v4369_v12 }
 0xc82   : > { %3135 = vst.msk [vmem:[#allocation2 + $0x8] sm:$0xff] %vm653_vm1, %v3133_v24 }
 0xc83   : > { %3140 = vst.msk [vmem:[#allocation3] sm:$0xff] %vm653_vm1, %v3132_v22  ;;  %3141 = vst.msk [vmem:[#allocation3 + $0x8] sm:$0xff] %vm653_vm1, %v3133_v24 }
 0xc84 PF: > { %s4481_s30 = sld [smem:[#allocation7_spill]]  ;;  %s3780_s15 = smov [#allocation3]  }
 0xc85   : > { %s3151_s28 = sshll.u32 %s3780_s15, 4  ;;  %s3152_s28 = int_to_ptr.vmem [resolvable:$true] %s3151_s28 }
 0xc86   : > { %s3716_s29 = scalar_lea.vmem %s3152_s28, 256  ;;  %p3723_p11 = scmp.lt.s32.totalorder %s3152_s28, %s3152_s28 }
 0xc87   : > { %p3717_p8 = scmp.ne.s32.totalorder %s3152_s28, %s3716_s29  ;;  %p3724_p12 = scmp.lt.s32.totalorder %s3716_s29, %s3716_s29 }
 0xc89   : > { %p3725_p13 = por %p3724_p12, %p3723_p11 }
 0xc8a   : > { %s4482_s21 = sadd.s32 4294967295, %s4481_s30  }
 0xc8b   : > { %p4425_p7 = scmp.eq.s32.totalorder %s4482_s21, 1 }
 0xc8d   : > { %p3718_p9 = pnand %p3717_p8, %p4425_p7 }
 0xc8f   : > { %p3719_p10 = pneg %p3718_p9 }
 0xc91   : > { %p3726_p0 = pnand %p3725_p13, %p3719_p10 }
 0xc93   : > { %3729 = shalt.err (!%p3726_p0)
}
 0xc94   : > { %s3781_s25 = smov 128   ;;  %s4484_s18 = sld [smem:[#allocation12_spill]] }
 0xc9a   : > { %3598 = dma.vmem_to_hbm [thread:$0]  (%p4425_p7), %s3152_s28, 256, %s4484_s18, [#allocation4], %s3781_s25, %s3781_s25, %s3778_s13  }
 0xc9b   : > { %3753 = dma.done.wait (%p4425_p7), [#allocation4], 256  }
 0xc9c   : > { %3755 = vsyncadd (%p4425_p7), [#allocation4], 4294967040 }
 0xc9d PF: > { %s4485_s22 = sld [smem:[#allocation7_spill]] }
 0xc9e   : > { %s4486_s25 = sld [smem:[#allocation6_spill]] }
 0xc9f   : > { %s4487_s26 = sld [smem:[#allocation8_spill]] }
 0xca3   : > { %s24_s27 = sadd.s32 1, %s4485_s22  }
 0xca4   : > { %p21_p1 = scmp.ge.s32.totalorder %s24_s27, 4  }
 0xca6   :  { %23 = sbr.rel (!%p21_p1) target bundleno = 6 (0x6), region = 144 }
 0xcab   :  { %3167 = vsyncpa [#allocation4], 1 }
 0xcac   :  { %3169 = vsyncpa [#allocation4 + $0x1], 1 }

</bundles_post_ra>
